<compile_context>
chip_gen: v7x
topology: tpu7x:2x2x1
jax: 0.10.0
libtpu: 0.0.40
codegen_flags: <defaults>
</compile_context>

<pallas_src>
import functools

import jax
import jax.numpy as jnp
import numpy as np
from jax.experimental import pallas as pl
from jax.experimental.pallas import tpu as pltpu


# ----------------------------------------------------------------------------
# Fused kernel: one grid step == one image, everything resident in VMEM.
# Layouts used inside the kernel (all 2-D, lane-dense):
#   pixel-interleaved:  lane = w*C + c          (x, a1, a2, y)
#   channel-planar:     lane = c*W + w          (concat [p1|p2], gate)
#   squeeze slab:       lane = [avg(0..W-1) | max(W..2W-1)]
# ----------------------------------------------------------------------------
def _lsk_kernel(x_ref, d5_ref, b5_ref, d7_ref, b7_ref, m1_ref, m2_ref, bc_ref,
                g_ref, bs_ref, e_ref, mf_ref, bf_ref, o_ref,
                xp5_ref, ap7_ref, chs_ref, agg_ref, *, H, W, C):
    f32 = jnp.float32
    WC = W * C

    # ---- conv0: depthwise 5x5, pad 2 (5 row-shifted MXU matmuls) -----------
    xp5_ref[0:2, :] = jnp.zeros((2, WC), f32)
    xp5_ref[2 + H:4 + H, :] = jnp.zeros((2, WC), f32)
    xp5_ref[2:2 + H, :] = x_ref[0]
    acc = jnp.zeros((H, WC), f32)
    for kh in range(5):
        acc = acc + jnp.dot(xp5_ref[kh:kh + H, :], d5_ref[kh],
                            preferred_element_type=f32)
    a1 = acc + b5_ref[...]

    # ---- conv_spatial: depthwise 7x7, dilation 3, pad 9 --------------------
    ap7_ref[0:9, :] = jnp.zeros((9, WC), f32)
    ap7_ref[9 + H:18 + H, :] = jnp.zeros((9, WC), f32)
    ap7_ref[9:9 + H, :] = a1
    acc = jnp.zeros((H, WC), f32)
    for kh in range(7):
        acc = acc + jnp.dot(ap7_ref[3 * kh:3 * kh + H, :], d7_ref[kh],
                            preferred_element_type=f32)
    a2 = acc + b7_ref[...]

    # ---- conv1 / conv2 (1x1) -> channel-planar concat [p1 | p2] ------------
    chs = (jnp.dot(a1, m1_ref[...], preferred_element_type=f32)
           + jnp.dot(a2, m2_ref[...], preferred_element_type=f32)
           + bc_ref[...])
    chs_ref[...] = chs

    # ---- per-pixel mean / max over the C concatenated channels -------------
    s = chs_ref[:, 0:W]
    m = chs_ref[:, 0:W]
    for c in range(1, C):
        plane = chs_ref[:, c * W:(c + 1) * W]
        s = s + plane
        m = jnp.maximum(m, plane)
    avg = s * (1.0 / C)

    # ---- conv_squeeze (7x7, 2->2) on [avg | max] slab, then sigmoid --------
    agg_ref[0:3, :] = jnp.zeros((3, 2 * W), f32)
    agg_ref[3 + H:6 + H, :] = jnp.zeros((3, 2 * W), f32)
    agg_ref[3:3 + H, 0:W] = avg
    agg_ref[3:3 + H, W:2 * W] = m
    accz = jnp.zeros((H, 2 * W), f32)
    for kh in range(7):
        accz = accz + jnp.dot(agg_ref[kh:kh + H, :], g_ref[kh],
                              preferred_element_type=f32)
    sig = jax.nn.sigmoid(accz + bs_ref[...])

    # ---- gate broadcast, p1/p2 mix, final 1x1 conv (mix folded into Mf) ----
    gate = jnp.dot(sig, e_ref[...], preferred_element_type=f32)
    y = jnp.dot(chs * gate, mf_ref[...], preferred_element_type=f32) + bf_ref[...]
    o_ref[0] = y


# ----------------------------------------------------------------------------
# Host-side construction of the block-structured weight matrices (runs once
# per call under jit; pure vectorized gathers/scatters, no python-scalar ops).
# ----------------------------------------------------------------------------
def _build_lsk_matrices(p, H, W, C):
    f32 = jnp.float32
    Ch = C // 2
    WC = W * C

    w5 = p["conv0_w"].astype(f32)                 # (C, 1, 5, 5)
    w7 = p["conv_spatial_w"].astype(f32)          # (C, 1, 7, 7)
    w1 = p["conv1_w"][:, :, 0, 0].astype(f32)     # (Ch, C)
    w2 = p["conv2_w"][:, :, 0, 0].astype(f32)     # (Ch, C)
    wsq = p["conv_squeeze_w"].astype(f32)         # (2, 2, 7, 7)
    wf = p["conv_w"][:, :, 0, 0].astype(f32)      # (C, Ch)

    # Depthwise conv -> per-kh lane-mixing matrices (pixel-interleaved layout).
    def dw_matrices(w, K, dil, pad):
        kh, kw, wv, c = np.meshgrid(np.arange(K), np.arange(K),
                                    np.arange(W), np.arange(C), indexing="ij")
        src = wv + kw * dil - pad                 # input pixel column per tap
        valid = (src >= 0) & (src < W)            # zero padding along W
        rows = np.clip(src, 0, W - 1) * C + c
        cols = wv * C + c
        vals = jnp.where(jnp.asarray(valid), w[c, 0, kh, kw], 0.0)
        return jnp.zeros((K, WC, WC), f32).at[kh, rows, cols].add(vals)

    D5 = dw_matrices(w5, 5, 1, 2)
    D7 = dw_matrices(w7, 7, 3, 9)
    b5r = jnp.tile(p["conv0_b"].astype(f32), W).reshape(1, WC)
    b7r = jnp.tile(p["conv_spatial_b"].astype(f32), W).reshape(1, WC)

    # 1x1 convs: pixel-interleaved (lane = w*C+ci) -> channel-planar (co*W+w).
    wv, ci, co = np.meshgrid(np.arange(W), np.arange(C), np.arange(Ch),
                             indexing="ij")
    M1 = jnp.zeros((WC, C * W), f32).at[wv * C + ci, co * W + wv].add(w1[co, ci])
    M2 = jnp.zeros((WC, C * W), f32).at[wv * C + ci,
                                        (co + Ch) * W + wv].add(w2[co, ci])
    bcp = jnp.repeat(jnp.concatenate([p["conv1_b"], p["conv2_b"]]).astype(f32),
                     W).reshape(1, C * W)

    # conv_squeeze (7x7, 2->2) as 7 row matmuls over the [avg | max] slab.
    kh, kw, o, j = np.meshgrid(np.arange(7), np.arange(7),
                               np.arange(2), np.arange(W), indexing="ij")
    src = j + kw - 3
    valid = (src >= 0) & (src < W)
    srcc = np.clip(src, 0, W - 1)
    G = jnp.zeros((7, 2 * W, 2 * W), f32)
    G = G.at[kh, srcc, o * W + j].add(
        jnp.where(jnp.asarray(valid), wsq[o, 0, kh, kw], 0.0))
    G = G.at[kh, W + srcc, o * W + j].add(
        jnp.where(jnp.asarray(valid), wsq[o, 1, kh, kw], 0.0))
    bsr = jnp.repeat(p["conv_squeeze_b"].astype(f32), W).reshape(1, 2 * W)

    # Broadcast sig0/sig1 over the C channel planes (planar layout).
    oin, cof, wv2 = np.meshgrid(np.arange(2), np.arange(Ch), np.arange(W),
                                indexing="ij")
    E = (jnp.zeros((2 * W, C * W), f32)
         .at[oin * W + wv2, (oin * Ch + cof) * W + wv2].add(1.0))

    # Final 1x1 conv, with the p1*sig0 + p2*sig1 summation folded in.
    co2, wv3, o2 = np.meshgrid(np.arange(C), np.arange(W), np.arange(C),
                               indexing="ij")
    Mf = jnp.zeros((C * W, WC), f32).at[co2 * W + wv3,
                                        wv3 * C + o2].add(wf[o2, co2 % Ch])
    bfr = jnp.tile(p["conv_b"].astype(f32), W).reshape(1, WC)

    return (D5, b5r, D7, b7r, M1, M2, bcp, G, bsr, E, Mf, bfr)


# ----------------------------------------------------------------------------
# pallas_call wrapper
# ----------------------------------------------------------------------------
def _lsk_pallas(x_flat, mats, H, W, C):
    NB = x_flat.shape[0]
    WC = W * C

    def const_spec(a):
        n = a.ndim
        return pl.BlockSpec(a.shape, lambda b: (0,) * n)

    kernel = functools.partial(_lsk_kernel, H=H, W=W, C=C)

    flops = (NB * 2 * H * WC * WC * (5 + 7 + 2 + 1)
             + NB * 2 * H * (2 * W) * (2 * W) * 7
             + NB * 2 * H * (2 * W) * WC)
    bytes_accessed = 4 * (2 * NB * H * WC
                          + sum(int(np.prod(m.shape)) for m in mats))
    cost = pl.CostEstimate(flops=int(flops),
                           transcendentals=int(NB * H * 2 * W),
                           bytes_accessed=int(bytes_accessed))

    return pl.pallas_call(
        kernel,
        out_shape=jax.ShapeDtypeStruct((NB, H, WC), jnp.float32),
        grid=(NB,),
        in_specs=[pl.BlockSpec((1, H, WC), lambda b: (b, 0, 0))]
                 + [const_spec(m) for m in mats],
        out_specs=pl.BlockSpec((1, H, WC), lambda b: (b, 0, 0)),
        scratch_shapes=[
            pltpu.VMEM((H + 4, WC), jnp.float32),      # row-padded x   (5x5)
            pltpu.VMEM((H + 18, WC), jnp.float32),     # row-padded a1  (7x7 dil3)
            pltpu.VMEM((H, C * W), jnp.float32),       # channel-planar [p1|p2]
            pltpu.VMEM((H + 6, 2 * W), jnp.float32),   # row-padded [avg|max]
        ],
        compiler_params=pltpu.CompilerParams(
            dimension_semantics=("parallel",),
            vmem_limit_bytes=32 * 1024 * 1024,
        ),
        cost_estimate=cost,
    )(x_flat, *mats)


# ----------------------------------------------------------------------------
# Full LSKModule forward: both inputs share weights, so they are batched
# together and processed by a single fused kernel with grid=(2B,).
# ----------------------------------------------------------------------------
def lsk_forward(x1_nchw, x2_nchw, p):
    B, C, H, W = x1_nchw.shape
    x = jnp.concatenate([x1_nchw, x2_nchw], axis=0).astype(jnp.float32)
    x = jnp.transpose(x, (0, 2, 3, 1)).reshape(2 * B, H, W * C)   # lane-dense
    mats = _build_lsk_matrices(p, H, W, C)
    y = _lsk_pallas(x, mats, H, W, C)
    y = y.reshape(2 * B, H, W, C).transpose(0, 3, 1, 2)           # back to NCHW
    return y[:B], y[B:]


# ----------------------------------------------------------------------------
# Pure-JAX (XLA) reference mirroring the PyTorch module, for validation.
# ----------------------------------------------------------------------------
def lsk_reference(x1, x2, p):
    def dw(x, w, b, dil, pad):
        C = x.shape[1]
        out = jax.lax.conv_general_dilated(
            x, w, window_strides=(1, 1), padding=((pad, pad), (pad, pad)),
            rhs_dilation=(dil, dil),
            dimension_numbers=("NCHW", "OIHW", "NCHW"), feature_group_count=C)
        return out + b[None, :, None, None]

    def conv(x, w, b, pad=0):
        out = jax.lax.conv_general_dilated(
            x, w, window_strides=(1, 1), padding=((pad, pad), (pad, pad)),
            dimension_numbers=("NCHW", "OIHW", "NCHW"))
        return out + b[None, :, None, None]

    def branch(x):
        a1 = dw(x, p["conv0_w"], p["conv0_b"], 1, 2)
        a2 = dw(a1, p["conv_spatial_w"], p["conv_spatial_b"], 3, 9)
        p1 = conv(a1, p["conv1_w"], p["conv1_b"])
        p2 = conv(a2, p["conv2_w"], p["conv2_b"])
        attn = jnp.concatenate([p1, p2], axis=1)
        avg = jnp.mean(attn, axis=1, keepdims=True)
        mx = jnp.max(attn, axis=1, keepdims=True)
        agg = jnp.concatenate([avg, mx], axis=1)
        sig = jax.nn.sigmoid(conv(agg, p["conv_squeeze_w"],
                                  p["conv_squeeze_b"], pad=3))
        mixed = p1 * sig[:, 0:1] + p2 * sig[:, 1:2]
        return conv(mixed, p["conv_w"], p["conv_b"])

    return branch(x1), branch(x2)


if __name__ == "__main__":
    C = 8          # feat_channels (even, so C // 2 = 4);  W*C = 128 -> lane dense
    B, H, W = 2, 16, 16

    key = jax.random.PRNGKey(0)
    ks = jax.random.split(key, 16)

    def rnd(k, shape, scale):
        return scale * jax.random.normal(k, shape, jnp.float32)

    # Deterministic synthetic parameters, shapes as in LSKModule.__init__ (torch layouts).
    params = {
        "conv0_w": rnd(ks[0], (C, 1, 5, 5), 0.2),
        "conv0_b": rnd(ks[1], (C,), 0.1),
        "conv_spatial_w": rnd(ks[2], (C, 1, 7, 7), 0.1),
        "conv_spatial_b": rnd(ks[3], (C,), 0.1),
        "conv1_w": rnd(ks[4], (C // 2, C, 1, 1), 0.3),
        "conv1_b": rnd(ks[5], (C // 2,), 0.1),
        "conv2_w": rnd(ks[6], (C // 2, C, 1, 1), 0.3),
        "conv2_b": rnd(ks[7], (C // 2,), 0.1),
        "conv_squeeze_w": rnd(ks[8], (2, 2, 7, 7), 0.2),
        "conv_squeeze_b": rnd(ks[9], (2,), 0.1),
        "conv_w": rnd(ks[10], (C, C // 2, 1, 1), 0.3),
        "conv_b": rnd(ks[11], (C,), 0.1),
    }

    x1 = jax.random.normal(ks[12], (B, C, H, W), jnp.float32)
    x2 = jax.random.normal(ks[13], (B, C, H, W), jnp.float32)

    y1, y2 = jax.jit(lsk_forward)(x1, x2, params)
    jax.block_until_ready((y1, y2))

    r1, r2 = lsk_reference(x1, x2, params)
    np.testing.assert_allclose(np.asarray(y1), np.asarray(r1), rtol=5e-3, atol=5e-3)
    np.testing.assert_allclose(np.asarray(y2), np.asarray(r2), rtol=5e-3, atol=5e-3)

    print("KERNEL_OK")
</pallas_src>

<mosaic_0001>
module attributes {stable_mosaic.version = 11 : i64} {
  func.func private @main(%arg0: i32) attributes {dimension_semantics = [#tpu.dimension_semantics<core_parallel>], iteration_bounds = array<i64: 2>, tpu.core_type = #tpu.core_type<sc_scalar_subcore>, window_params = []} {
    return
  }
}

module attributes {stable_mosaic.version = 11 : i64} {
  func.func private @main(%arg0: i32) attributes {dimension_semantics = [#tpu.dimension_semantics<core_parallel>], iteration_bounds = array<i64: 2>, tpu.core_type = #tpu.core_type<sc_scalar_subcore>, window_params = []} {
    return
  }
}

module attributes {stable_mosaic.version = 11 : i64} {
  func.func @_lsk_kernel(%arg0: i32, %arg1: memref<1x16x128xf32, #tpu.memory_space<vmem>>, %arg2: memref<5x128x128xf32, #tpu.memory_space<vmem>>, %arg3: memref<1x128xf32, #tpu.memory_space<vmem>>, %arg4: memref<7x128x128xf32, #tpu.memory_space<vmem>>, %arg5: memref<1x128xf32, #tpu.memory_space<vmem>>, %arg6: memref<128x128xf32, #tpu.memory_space<vmem>>, %arg7: memref<128x128xf32, #tpu.memory_space<vmem>>, %arg8: memref<1x128xf32, #tpu.memory_space<vmem>>, %arg9: memref<7x32x32xf32, #tpu.memory_space<vmem>>, %arg10: memref<1x32xf32, #tpu.memory_space<vmem>>, %arg11: memref<32x128xf32, #tpu.memory_space<vmem>>, %arg12: memref<128x128xf32, #tpu.memory_space<vmem>>, %arg13: memref<1x128xf32, #tpu.memory_space<vmem>>, %arg14: memref<1x16x128xf32, #tpu.memory_space<vmem>>, %arg15: memref<20x128xf32, #tpu.memory_space<vmem>>, %arg16: memref<34x128xf32, #tpu.memory_space<vmem>>, %arg17: memref<16x128xf32, #tpu.memory_space<vmem>>, %arg18: memref<22x32xf32, #tpu.memory_space<vmem>>) attributes {dimension_semantics = [#tpu.dimension_semantics<parallel>], iteration_bounds = array<i64: 4>, scalar_prefetch = 0 : i64, scratch_operands = 4 : i64, tpu.core_type = #tpu.core_type<tc>, window_params = [{transform_indices = @transform_0, window_bounds = array<i64: 1, 16, 128>}, {pipeline_mode = #tpu.pipeline_mode<synchronous>, transform_indices = @transform_1, window_bounds = array<i64: 5, 128, 128>}, {pipeline_mode = #tpu.pipeline_mode<synchronous>, transform_indices = @transform_2, window_bounds = array<i64: 1, 128>}, {pipeline_mode = #tpu.pipeline_mode<synchronous>, transform_indices = @transform_3, window_bounds = array<i64: 7, 128, 128>}, {pipeline_mode = #tpu.pipeline_mode<synchronous>, transform_indices = @transform_4, window_bounds = array<i64: 1, 128>}, {pipeline_mode = #tpu.pipeline_mode<synchronous>, transform_indices = @transform_5, window_bounds = array<i64: 128, 128>}, {pipeline_mode = #tpu.pipeline_mode<synchronous>, transform_indices = @transform_6, window_bounds = array<i64: 128, 128>}, {pipeline_mode = #tpu.pipeline_mode<synchronous>, transform_indices = @transform_7, window_bounds = array<i64: 1, 128>}, {pipeline_mode = #tpu.pipeline_mode<synchronous>, transform_indices = @transform_8, window_bounds = array<i64: 7, 32, 32>}, {pipeline_mode = #tpu.pipeline_mode<synchronous>, transform_indices = @transform_9, window_bounds = array<i64: 1, 32>}, {pipeline_mode = #tpu.pipeline_mode<synchronous>, transform_indices = @transform_10, window_bounds = array<i64: 32, 128>}, {pipeline_mode = #tpu.pipeline_mode<synchronous>, transform_indices = @transform_11, window_bounds = array<i64: 128, 128>}, {pipeline_mode = #tpu.pipeline_mode<synchronous>, transform_indices = @transform_12, window_bounds = array<i64: 1, 128>}, {transform_indices = @transform_13, window_bounds = array<i64: 1, 16, 128>}]} {
    %cst = arith.constant 0.000000e+00 : f32
    %0 = vector.broadcast %cst : f32 to vector<2x128xf32>
    %c0 = arith.constant 0 : index
    %c0_0 = arith.constant 0 : index
    %1 = vector.load %arg15[%c0, %c0_0] : memref<20x128xf32, #tpu.memory_space<vmem>>, vector<2x128xf32>
    tpu.vector_store %arg15[%c0, %c0_0], %0 {strides = array<i32>} : memref<20x128xf32, #tpu.memory_space<vmem>>, vector<2x128xf32>,
    %cst_1 = arith.constant 0.000000e+00 : f32
    %2 = vector.broadcast %cst_1 : f32 to vector<2x128xf32>
    %c18 = arith.constant 18 : index
    %c0_2 = arith.constant 0 : index
    %3 = vector.load %arg15[%c18, %c0_2] : memref<20x128xf32, #tpu.memory_space<vmem>>, vector<2x128xf32>
    tpu.vector_store %arg15[%c18, %c0_2], %2 {strides = array<i32>} : memref<20x128xf32, #tpu.memory_space<vmem>>, vector<2x128xf32>,
    %c0_3 = arith.constant 0 : index
    %c0_4 = arith.constant 0 : index
    %c0_5 = arith.constant 0 : index
    %4 = vector.load %arg1[%c0_3, %c0_4, %c0_5] : memref<1x16x128xf32, #tpu.memory_space<vmem>>, vector<1x16x128xf32>
    %5 = vector.shape_cast %4 : vector<1x16x128xf32> to vector<16x128xf32>
    %c2 = arith.constant 2 : index
    %c0_6 = arith.constant 0 : index
    %6 = vector.load %arg15[%c2, %c0_6] : memref<20x128xf32, #tpu.memory_space<vmem>>, vector<16x128xf32>
    tpu.vector_store %arg15[%c2, %c0_6], %5 {strides = array<i32>} : memref<20x128xf32, #tpu.memory_space<vmem>>, vector<16x128xf32>,
    %cst_7 = arith.constant 0.000000e+00 : f32
    %7 = vector.broadcast %cst_7 : f32 to vector<16x128xf32>
    %c0_8 = arith.constant 0 : index
    %c0_9 = arith.constant 0 : index
    %8 = vector.load %arg15[%c0_8, %c0_9] : memref<20x128xf32, #tpu.memory_space<vmem>>, vector<16x128xf32>
    %c0_10 = arith.constant 0 : index
    %c0_11 = arith.constant 0 : index
    %c0_12 = arith.constant 0 : index
    %9 = vector.load %arg2[%c0_10, %c0_11, %c0_12] : memref<5x128x128xf32, #tpu.memory_space<vmem>>, vector<1x128x128xf32>
    %10 = vector.shape_cast %9 : vector<1x128x128xf32> to vector<128x128xf32>
    %cst_13 = arith.constant dense<0.000000e+00> : vector<16x128xf32>
    %11 = tpu.matmul %8, %10, %cst_13 {dimension_numbers = #tpu.dot_dimension_numbers<[1], [0], [0], [1], [0, 0, 1, 1], [], []>} : vector<16x128xf32>, vector<128x128xf32>, vector<16x128xf32> -> vector<16x128xf32>
    %12 = arith.addf %7, %11 : vector<16x128xf32>
    %c1 = arith.constant 1 : index
    %c0_14 = arith.constant 0 : index
    %13 = vector.load %arg15[%c1, %c0_14] : memref<20x128xf32, #tpu.memory_space<vmem>>, vector<16x128xf32>
    %c1_15 = arith.constant 1 : index
    %c0_16 = arith.constant 0 : index
    %c0_17 = arith.constant 0 : index
    %14 = vector.load %arg2[%c1_15, %c0_16, %c0_17] : memref<5x128x128xf32, #tpu.memory_space<vmem>>, vector<1x128x128xf32>
    %15 = vector.shape_cast %14 : vector<1x128x128xf32> to vector<128x128xf32>
    %cst_18 = arith.constant dense<0.000000e+00> : vector<16x128xf32>
    %16 = tpu.matmul %13, %15, %cst_18 {dimension_numbers = #tpu.dot_dimension_numbers<[1], [0], [0], [1], [0, 0, 1, 1], [], []>} : vector<16x128xf32>, vector<128x128xf32>, vector<16x128xf32> -> vector<16x128xf32>
    %17 = arith.addf %12, %16 : vector<16x128xf32>
    %c2_19 = arith.constant 2 : index
    %c0_20 = arith.constant 0 : index
    %18 = vector.load %arg15[%c2_19, %c0_20] : memref<20x128xf32, #tpu.memory_space<vmem>>, vector<16x128xf32>
    %c2_21 = arith.constant 2 : index
    %c0_22 = arith.constant 0 : index
    %c0_23 = arith.constant 0 : index
    %19 = vector.load %arg2[%c2_21, %c0_22, %c0_23] : memref<5x128x128xf32, #tpu.memory_space<vmem>>, vector<1x128x128xf32>
    %20 = vector.shape_cast %19 : vector<1x128x128xf32> to vector<128x128xf32>
    %cst_24 = arith.constant dense<0.000000e+00> : vector<16x128xf32>
    %21 = tpu.matmul %18, %20, %cst_24 {dimension_numbers = #tpu.dot_dimension_numbers<[1], [0], [0], [1], [0, 0, 1, 1], [], []>} : vector<16x128xf32>, vector<128x128xf32>, vector<16x128xf32> -> vector<16x128xf32>
    %22 = arith.addf %17, %21 : vector<16x128xf32>
    %c3 = arith.constant 3 : index
    %c0_25 = arith.constant 0 : index
    %23 = vector.load %arg15[%c3, %c0_25] : memref<20x128xf32, #tpu.memory_space<vmem>>, vector<16x128xf32>
    %c3_26 = arith.constant 3 : index
    %c0_27 = arith.constant 0 : index
    %c0_28 = arith.constant 0 : index
    %24 = vector.load %arg2[%c3_26, %c0_27, %c0_28] : memref<5x128x128xf32, #tpu.memory_space<vmem>>, vector<1x128x128xf32>
    %25 = vector.shape_cast %24 : vector<1x128x128xf32> to vector<128x128xf32>
    %cst_29 = arith.constant dense<0.000000e+00> : vector<16x128xf32>
    %26 = tpu.matmul %23, %25, %cst_29 {dimension_numbers = #tpu.dot_dimension_numbers<[1], [0], [0], [1], [0, 0, 1, 1], [], []>} : vector<16x128xf32>, vector<128x128xf32>, vector<16x128xf32> -> vector<16x128xf32>
    %27 = arith.addf %22, %26 : vector<16x128xf32>
    %c4 = arith.constant 4 : index
    %c0_30 = arith.constant 0 : index
    %28 = vector.load %arg15[%c4, %c0_30] : memref<20x128xf32, #tpu.memory_space<vmem>>, vector<16x128xf32>
    %c4_31 = arith.constant 4 : index
    %c0_32 = arith.constant 0 : index
    %c0_33 = arith.constant 0 : index
    %29 = vector.load %arg2[%c4_31, %c0_32, %c0_33] : memref<5x128x128xf32, #tpu.memory_space<vmem>>, vector<1x128x128xf32>
    %30 = vector.shape_cast %29 : vector<1x128x128xf32> to vector<128x128xf32>
    %cst_34 = arith.constant dense<0.000000e+00> : vector<16x128xf32>
    %31 = tpu.matmul %28, %30, %cst_34 {dimension_numbers = #tpu.dot_dimension_numbers<[1], [0], [0], [1], [0, 0, 1, 1], [], []>} : vector<16x128xf32>, vector<128x128xf32>, vector<16x128xf32> -> vector<16x128xf32>
    %32 = arith.addf %27, %31 : vector<16x128xf32>
    %c0_35 = arith.constant 0 : index
    %c0_36 = arith.constant 0 : index
    %33 = vector.load %arg3[%c0_35, %c0_36] : memref<1x128xf32, #tpu.memory_space<vmem>>, vector<1x128xf32>
    %34 = vector.broadcast %33 : vector<1x128xf32> to vector<16x128xf32>
    %35 = arith.addf %32, %34 : vector<16x128xf32>
    %cst_37 = arith.constant 0.000000e+00 : f32
    %36 = vector.broadcast %cst_37 : f32 to vector<9x128xf32>
    %c0_38 = arith.constant 0 : index
    %c0_39 = arith.constant 0 : index
    %37 = vector.load %arg16[%c0_38, %c0_39] : memref<34x128xf32, #tpu.memory_space<vmem>>, vector<9x128xf32>
    tpu.vector_store %arg16[%c0_38, %c0_39], %36 {strides = array<i32>} : memref<34x128xf32, #tpu.memory_space<vmem>>, vector<9x128xf32>,
    %cst_40 = arith.constant 0.000000e+00 : f32
    %38 = vector.broadcast %cst_40 : f32 to vector<9x128xf32>
    %c25 = arith.constant 25 : index
    %c0_41 = arith.constant 0 : index
    %39 = vector.load %arg16[%c25, %c0_41] : memref<34x128xf32, #tpu.memory_space<vmem>>, vector<9x128xf32>
    tpu.vector_store %arg16[%c25, %c0_41], %38 {strides = array<i32>} : memref<34x128xf32, #tpu.memory_space<vmem>>, vector<9x128xf32>,
    %c9 = arith.constant 9 : index
    %c0_42 = arith.constant 0 : index
    %40 = vector.load %arg16[%c9, %c0_42] : memref<34x128xf32, #tpu.memory_space<vmem>>, vector<16x128xf32>
    tpu.vector_store %arg16[%c9, %c0_42], %35 {strides = array<i32>} : memref<34x128xf32, #tpu.memory_space<vmem>>, vector<16x128xf32>,
    %cst_43 = arith.constant 0.000000e+00 : f32
    %41 = vector.broadcast %cst_43 : f32 to vector<16x128xf32>
    %c0_44 = arith.constant 0 : index
    %c0_45 = arith.constant 0 : index
    %42 = vector.load %arg16[%c0_44, %c0_45] : memref<34x128xf32, #tpu.memory_space<vmem>>, vector<16x128xf32>
    %c0_46 = arith.constant 0 : index
    %c0_47 = arith.constant 0 : index
    %c0_48 = arith.constant 0 : index
    %43 = vector.load %arg4[%c0_46, %c0_47, %c0_48] : memref<7x128x128xf32, #tpu.memory_space<vmem>>, vector<1x128x128xf32>
    %44 = vector.shape_cast %43 : vector<1x128x128xf32> to vector<128x128xf32>
    %cst_49 = arith.constant dense<0.000000e+00> : vector<16x128xf32>
    %45 = tpu.matmul %42, %44, %cst_49 {dimension_numbers = #tpu.dot_dimension_numbers<[1], [0], [0], [1], [0, 0, 1, 1], [], []>} : vector<16x128xf32>, vector<128x128xf32>, vector<16x128xf32> -> vector<16x128xf32>
    %46 = arith.addf %41, %45 : vector<16x128xf32>
    %c3_50 = arith.constant 3 : index
    %c0_51 = arith.constant 0 : index
    %47 = vector.load %arg16[%c3_50, %c0_51] : memref<34x128xf32, #tpu.memory_space<vmem>>, vector<16x128xf32>
    %c1_52 = arith.constant 1 : index
    %c0_53 = arith.constant 0 : index
    %c0_54 = arith.constant 0 : index
    %48 = vector.load %arg4[%c1_52, %c0_53, %c0_54] : memref<7x128x128xf32, #tpu.memory_space<vmem>>, vector<1x128x128xf32>
    %49 = vector.shape_cast %48 : vector<1x128x128xf32> to vector<128x128xf32>
    %cst_55 = arith.constant dense<0.000000e+00> : vector<16x128xf32>
    %50 = tpu.matmul %47, %49, %cst_55 {dimension_numbers = #tpu.dot_dimension_numbers<[1], [0], [0], [1], [0, 0, 1, 1], [], []>} : vector<16x128xf32>, vector<128x128xf32>, vector<16x128xf32> -> vector<16x128xf32>
    %51 = arith.addf %46, %50 : vector<16x128xf32>
    %c6 = arith.constant 6 : index
    %c0_56 = arith.constant 0 : index
    %52 = vector.load %arg16[%c6, %c0_56] : memref<34x128xf32, #tpu.memory_space<vmem>>, vector<16x128xf32>
    %c2_57 = arith.constant 2 : index
    %c0_58 = arith.constant 0 : index
    %c0_59 = arith.constant 0 : index
    %53 = vector.load %arg4[%c2_57, %c0_58, %c0_59] : memref<7x128x128xf32, #tpu.memory_space<vmem>>, vector<1x128x128xf32>
    %54 = vector.shape_cast %53 : vector<1x128x128xf32> to vector<128x128xf32>
    %cst_60 = arith.constant dense<0.000000e+00> : vector<16x128xf32>
    %55 = tpu.matmul %52, %54, %cst_60 {dimension_numbers = #tpu.dot_dimension_numbers<[1], [0], [0], [1], [0, 0, 1, 1], [], []>} : vector<16x128xf32>, vector<128x128xf32>, vector<16x128xf32> -> vector<16x128xf32>
    %56 = arith.addf %51, %55 : vector<16x128xf32>
    %c9_61 = arith.constant 9 : index
    %c0_62 = arith.constant 0 : index
    %57 = vector.load %arg16[%c9_61, %c0_62] : memref<34x128xf32, #tpu.memory_space<vmem>>, vector<16x128xf32>
    %c3_63 = arith.constant 3 : index
    %c0_64 = arith.constant 0 : index
    %c0_65 = arith.constant 0 : index
    %58 = vector.load %arg4[%c3_63, %c0_64, %c0_65] : memref<7x128x128xf32, #tpu.memory_space<vmem>>, vector<1x128x128xf32>
    %59 = vector.shape_cast %58 : vector<1x128x128xf32> to vector<128x128xf32>
    %cst_66 = arith.constant dense<0.000000e+00> : vector<16x128xf32>
    %60 = tpu.matmul %57, %59, %cst_66 {dimension_numbers = #tpu.dot_dimension_numbers<[1], [0], [0], [1], [0, 0, 1, 1], [], []>} : vector<16x128xf32>, vector<128x128xf32>, vector<16x128xf32> -> vector<16x128xf32>
    %61 = arith.addf %56, %60 : vector<16x128xf32>
    %c12 = arith.constant 12 : index
    %c0_67 = arith.constant 0 : index
    %62 = vector.load %arg16[%c12, %c0_67] : memref<34x128xf32, #tpu.memory_space<vmem>>, vector<16x128xf32>
    %c4_68 = arith.constant 4 : index
    %c0_69 = arith.constant 0 : index
    %c0_70 = arith.constant 0 : index
    %63 = vector.load %arg4[%c4_68, %c0_69, %c0_70] : memref<7x128x128xf32, #tpu.memory_space<vmem>>, vector<1x128x128xf32>
    %64 = vector.shape_cast %63 : vector<1x128x128xf32> to vector<128x128xf32>
    %cst_71 = arith.constant dense<0.000000e+00> : vector<16x128xf32>
    %65 = tpu.matmul %62, %64, %cst_71 {dimension_numbers = #tpu.dot_dimension_numbers<[1], [0], [0], [1], [0, 0, 1, 1], [], []>} : vector<16x128xf32>, vector<128x128xf32>, vector<16x128xf32> -> vector<16x128xf32>
    %66 = arith.addf %61, %65 : vector<16x128xf32>
    %c15 = arith.constant 15 : index
    %c0_72 = arith.constant 0 : index
    %67 = vector.load %arg16[%c15, %c0_72] : memref<34x128xf32, #tpu.memory_space<vmem>>, vector<16x128xf32>
    %c5 = arith.constant 5 : index
    %c0_73 = arith.constant 0 : index
    %c0_74 = arith.constant 0 : index
    %68 = vector.load %arg4[%c5, %c0_73, %c0_74] : memref<7x128x128xf32, #tpu.memory_space<vmem>>, vector<1x128x128xf32>
    %69 = vector.shape_cast %68 : vector<1x128x128xf32> to vector<128x128xf32>
    %cst_75 = arith.constant dense<0.000000e+00> : vector<16x128xf32>
    %70 = tpu.matmul %67, %69, %cst_75 {dimension_numbers = #tpu.dot_dimension_numbers<[1], [0], [0], [1], [0, 0, 1, 1], [], []>} : vector<16x128xf32>, vector<128x128xf32>, vector<16x128xf32> -> vector<16x128xf32>
    %71 = arith.addf %66, %70 : vector<16x128xf32>
    %c18_76 = arith.constant 18 : index
    %c0_77 = arith.constant 0 : index
    %72 = vector.load %arg16[%c18_76, %c0_77] : memref<34x128xf32, #tpu.memory_space<vmem>>, vector<16x128xf32>
    %c6_78 = arith.constant 6 : index
    %c0_79 = arith.constant 0 : index
    %c0_80 = arith.constant 0 : index
    %73 = vector.load %arg4[%c6_78, %c0_79, %c0_80] : memref<7x128x128xf32, #tpu.memory_space<vmem>>, vector<1x128x128xf32>
    %74 = vector.shape_cast %73 : vector<1x128x128xf32> to vector<128x128xf32>
    %cst_81 = arith.constant dense<0.000000e+00> : vector<16x128xf32>
    %75 = tpu.matmul %72, %74, %cst_81 {dimension_numbers = #tpu.dot_dimension_numbers<[1], [0], [0], [1], [0, 0, 1, 1], [], []>} : vector<16x128xf32>, vector<128x128xf32>, vector<16x128xf32> -> vector<16x128xf32>
    %76 = arith.addf %71, %75 : vector<16x128xf32>
    %c0_82 = arith.constant 0 : index
    %c0_83 = arith.constant 0 : index
    %77 = vector.load %arg5[%c0_82, %c0_83] : memref<1x128xf32, #tpu.memory_space<vmem>>, vector<1x128xf32>
    %78 = vector.broadcast %77 : vector<1x128xf32> to vector<16x128xf32>
    %79 = arith.addf %76, %78 : vector<16x128xf32>
    %c0_84 = arith.constant 0 : index
    %c0_85 = arith.constant 0 : index
    %80 = vector.load %arg6[%c0_84, %c0_85] : memref<128x128xf32, #tpu.memory_space<vmem>>, vector<128x128xf32>
    %cst_86 = arith.constant dense<0.000000e+00> : vector<16x128xf32>
    %81 = tpu.matmul %35, %80, %cst_86 {dimension_numbers = #tpu.dot_dimension_numbers<[1], [0], [0], [1], [0, 0, 1, 1], [], []>} : vector<16x128xf32>, vector<128x128xf32>, vector<16x128xf32> -> vector<16x128xf32>
    %c0_87 = arith.constant 0 : index
    %c0_88 = arith.constant 0 : index
    %82 = vector.load %arg7[%c0_87, %c0_88] : memref<128x128xf32, #tpu.memory_space<vmem>>, vector<128x128xf32>
    %cst_89 = arith.constant dense<0.000000e+00> : vector<16x128xf32>
    %83 = tpu.matmul %79, %82, %cst_89 {dimension_numbers = #tpu.dot_dimension_numbers<[1], [0], [0], [1], [0, 0, 1, 1], [], []>} : vector<16x128xf32>, vector<128x128xf32>, vector<16x128xf32> -> vector<16x128xf32>
    %84 = arith.addf %81, %83 : vector<16x128xf32>
    %c0_90 = arith.constant 0 : index
    %c0_91 = arith.constant 0 : index
    %85 = vector.load %arg8[%c0_90, %c0_91] : memref<1x128xf32, #tpu.memory_space<vmem>>, vector<1x128xf32>
    %86 = vector.broadcast %85 : vector<1x128xf32> to vector<16x128xf32>
    %87 = arith.addf %84, %86 : vector<16x128xf32>
    %c0_92 = arith.constant 0 : index
    %c0_93 = arith.constant 0 : index
    %88 = vector.load %arg17[%c0_92, %c0_93] : memref<16x128xf32, #tpu.memory_space<vmem>>, vector<16x128xf32>
    tpu.vector_store %arg17[%c0_92, %c0_93], %87 {strides = array<i32>} : memref<16x128xf32, #tpu.memory_space<vmem>>, vector<16x128xf32>,
    %c0_94 = arith.constant 0 : index
    %c0_95 = arith.constant 0 : index
    %89 = vector.load %arg17[%c0_94, %c0_95] : memref<16x128xf32, #tpu.memory_space<vmem>>, vector<16x16xf32>
    %c0_96 = arith.constant 0 : index
    %c0_97 = arith.constant 0 : index
    %90 = vector.load %arg17[%c0_96, %c0_97] : memref<16x128xf32, #tpu.memory_space<vmem>>, vector<16x16xf32>
    %c0_98 = arith.constant 0 : index
    %c16 = arith.constant 16 : index
    %91 = vector.load %arg17[%c0_98, %c16] : memref<16x128xf32, #tpu.memory_space<vmem>>, vector<16x16xf32>
    %92 = arith.addf %89, %91 : vector<16x16xf32>
    %93 = arith.maximumf %90, %91 : vector<16x16xf32>
    %c0_99 = arith.constant 0 : index
    %c32 = arith.constant 32 : index
    %94 = vector.load %arg17[%c0_99, %c32] : memref<16x128xf32, #tpu.memory_space<vmem>>, vector<16x16xf32>
    %95 = arith.addf %92, %94 : vector<16x16xf32>
    %96 = arith.maximumf %93, %94 : vector<16x16xf32>
    %c0_100 = arith.constant 0 : index
    %c48 = arith.constant 48 : index
    %97 = vector.load %arg17[%c0_100, %c48] : memref<16x128xf32, #tpu.memory_space<vmem>>, vector<16x16xf32>
    %98 = arith.addf %95, %97 : vector<16x16xf32>
    %99 = arith.maximumf %96, %97 : vector<16x16xf32>
    %c0_101 = arith.constant 0 : index
    %c64 = arith.constant 64 : index
    %100 = vector.load %arg17[%c0_101, %c64] : memref<16x128xf32, #tpu.memory_space<vmem>>, vector<16x16xf32>
    %101 = arith.addf %98, %100 : vector<16x16xf32>
    %102 = arith.maximumf %99, %100 : vector<16x16xf32>
    %c0_102 = arith.constant 0 : index
    %c80 = arith.constant 80 : index
    %103 = vector.load %arg17[%c0_102, %c80] : memref<16x128xf32, #tpu.memory_space<vmem>>, vector<16x16xf32>
    %104 = arith.addf %101, %103 : vector<16x16xf32>
    %105 = arith.maximumf %102, %103 : vector<16x16xf32>
    %c0_103 = arith.constant 0 : index
    %c96 = arith.constant 96 : index
    %106 = vector.load %arg17[%c0_103, %c96] : memref<16x128xf32, #tpu.memory_space<vmem>>, vector<16x16xf32>
    %107 = arith.addf %104, %106 : vector<16x16xf32>
    %108 = arith.maximumf %105, %106 : vector<16x16xf32>
    %c0_104 = arith.constant 0 : index
    %c112 = arith.constant 112 : index
    %109 = vector.load %arg17[%c0_104, %c112] : memref<16x128xf32, #tpu.memory_space<vmem>>, vector<16x16xf32>
    %110 = arith.addf %107, %109 : vector<16x16xf32>
    %111 = arith.maximumf %108, %109 : vector<16x16xf32>
    %cst_105 = arith.constant 1.250000e-01 : f32
    %112 = vector.broadcast %cst_105 : f32 to vector<16x16xf32>
    %113 = arith.mulf %110, %112 : vector<16x16xf32>
    %cst_106 = arith.constant 0.000000e+00 : f32
    %114 = vector.broadcast %cst_106 : f32 to vector<3x32xf32>
    %c0_107 = arith.constant 0 : index
    %c0_108 = arith.constant 0 : index
    %115 = vector.load %arg18[%c0_107, %c0_108] : memref<22x32xf32, #tpu.memory_space<vmem>>, vector<3x32xf32>
    tpu.vector_store %arg18[%c0_107, %c0_108], %114 {strides = array<i32>} : memref<22x32xf32, #tpu.memory_space<vmem>>, vector<3x32xf32>,
    %cst_109 = arith.constant 0.000000e+00 : f32
    %116 = vector.broadcast %cst_109 : f32 to vector<3x32xf32>
    %c19 = arith.constant 19 : index
    %c0_110 = arith.constant 0 : index
    %117 = vector.load %arg18[%c19, %c0_110] : memref<22x32xf32, #tpu.memory_space<vmem>>, vector<3x32xf32>
    tpu.vector_store %arg18[%c19, %c0_110], %116 {strides = array<i32>} : memref<22x32xf32, #tpu.memory_space<vmem>>, vector<3x32xf32>,
    %c3_111 = arith.constant 3 : index
    %c0_112 = arith.constant 0 : index
    %118 = vector.load %arg18[%c3_111, %c0_112] : memref<22x32xf32, #tpu.memory_space<vmem>>, vector<16x16xf32>
    tpu.vector_store %arg18[%c3_111, %c0_112], %113 {strides = array<i32>} : memref<22x32xf32, #tpu.memory_space<vmem>>, vector<16x16xf32>,
    %c3_113 = arith.constant 3 : index
    %c16_114 = arith.constant 16 : index
    %119 = vector.load %arg18[%c3_113, %c16_114] : memref<22x32xf32, #tpu.memory_space<vmem>>, vector<16x16xf32>
    tpu.vector_store %arg18[%c3_113, %c16_114], %111 {strides = array<i32>} : memref<22x32xf32, #tpu.memory_space<vmem>>, vector<16x16xf32>,
    %cst_115 = arith.constant 0.000000e+00 : f32
    %120 = vector.broadcast %cst_115 : f32 to vector<16x32xf32>
    %c0_116 = arith.constant 0 : index
    %c0_117 = arith.constant 0 : index
    %121 = vector.load %arg18[%c0_116, %c0_117] : memref<22x32xf32, #tpu.memory_space<vmem>>, vector<16x32xf32>
    %c0_118 = arith.constant 0 : index
    %c0_119 = arith.constant 0 : index
    %c0_120 = arith.constant 0 : index
    %122 = vector.load %arg9[%c0_118, %c0_119, %c0_120] : memref<7x32x32xf32, #tpu.memory_space<vmem>>, vector<1x32x32xf32>
    %123 = vector.shape_cast %122 : vector<1x32x32xf32> to vector<32x32xf32>
    %cst_121 = arith.constant dense<0.000000e+00> : vector<16x32xf32>
    %124 = tpu.matmul %121, %123, %cst_121 {dimension_numbers = #tpu.dot_dimension_numbers<[1], [0], [0], [1], [0, 0, 1, 1], [], []>} : vector<16x32xf32>, vector<32x32xf32>, vector<16x32xf32> -> vector<16x32xf32>
    %125 = arith.addf %120, %124 : vector<16x32xf32>
    %c1_122 = arith.constant 1 : index
    %c0_123 = arith.constant 0 : index
    %126 = vector.load %arg18[%c1_122, %c0_123] : memref<22x32xf32, #tpu.memory_space<vmem>>, vector<16x32xf32>
    %c1_124 = arith.constant 1 : index
    %c0_125 = arith.constant 0 : index
    %c0_126 = arith.constant 0 : index
    %127 = vector.load %arg9[%c1_124, %c0_125, %c0_126] : memref<7x32x32xf32, #tpu.memory_space<vmem>>, vector<1x32x32xf32>
    %128 = vector.shape_cast %127 : vector<1x32x32xf32> to vector<32x32xf32>
    %cst_127 = arith.constant dense<0.000000e+00> : vector<16x32xf32>
    %129 = tpu.matmul %126, %128, %cst_127 {dimension_numbers = #tpu.dot_dimension_numbers<[1], [0], [0], [1], [0, 0, 1, 1], [], []>} : vector<16x32xf32>, vector<32x32xf32>, vector<16x32xf32> -> vector<16x32xf32>
    %130 = arith.addf %125, %129 : vector<16x32xf32>
    %c2_128 = arith.constant 2 : index
    %c0_129 = arith.constant 0 : index
    %131 = vector.load %arg18[%c2_128, %c0_129] : memref<22x32xf32, #tpu.memory_space<vmem>>, vector<16x32xf32>
    %c2_130 = arith.constant 2 : index
    %c0_131 = arith.constant 0 : index
    %c0_132 = arith.constant 0 : index
    %132 = vector.load %arg9[%c2_130, %c0_131, %c0_132] : memref<7x32x32xf32, #tpu.memory_space<vmem>>, vector<1x32x32xf32>
    %133 = vector.shape_cast %132 : vector<1x32x32xf32> to vector<32x32xf32>
    %cst_133 = arith.constant dense<0.000000e+00> : vector<16x32xf32>
    %134 = tpu.matmul %131, %133, %cst_133 {dimension_numbers = #tpu.dot_dimension_numbers<[1], [0], [0], [1], [0, 0, 1, 1], [], []>} : vector<16x32xf32>, vector<32x32xf32>, vector<16x32xf32> -> vector<16x32xf32>
    %135 = arith.addf %130, %134 : vector<16x32xf32>
    %c3_134 = arith.constant 3 : index
    %c0_135 = arith.constant 0 : index
    %136 = vector.load %arg18[%c3_134, %c0_135] : memref<22x32xf32, #tpu.memory_space<vmem>>, vector<16x32xf32>
    %c3_136 = arith.constant 3 : index
    %c0_137 = arith.constant 0 : index
    %c0_138 = arith.constant 0 : index
    %137 = vector.load %arg9[%c3_136, %c0_137, %c0_138] : memref<7x32x32xf32, #tpu.memory_space<vmem>>, vector<1x32x32xf32>
    %138 = vector.shape_cast %137 : vector<1x32x32xf32> to vector<32x32xf32>
    %cst_139 = arith.constant dense<0.000000e+00> : vector<16x32xf32>
    %139 = tpu.matmul %136, %138, %cst_139 {dimension_numbers = #tpu.dot_dimension_numbers<[1], [0], [0], [1], [0, 0, 1, 1], [], []>} : vector<16x32xf32>, vector<32x32xf32>, vector<16x32xf32> -> vector<16x32xf32>
    %140 = arith.addf %135, %139 : vector<16x32xf32>
    %c4_140 = arith.constant 4 : index
    %c0_141 = arith.constant 0 : index
    %141 = vector.load %arg18[%c4_140, %c0_141] : memref<22x32xf32, #tpu.memory_space<vmem>>, vector<16x32xf32>
    %c4_142 = arith.constant 4 : index
    %c0_143 = arith.constant 0 : index
    %c0_144 = arith.constant 0 : index
    %142 = vector.load %arg9[%c4_142, %c0_143, %c0_144] : memref<7x32x32xf32, #tpu.memory_space<vmem>>, vector<1x32x32xf32>
    %143 = vector.shape_cast %142 : vector<1x32x32xf32> to vector<32x32xf32>
    %cst_145 = arith.constant dense<0.000000e+00> : vector<16x32xf32>
    %144 = tpu.matmul %141, %143, %cst_145 {dimension_numbers = #tpu.dot_dimension_numbers<[1], [0], [0], [1], [0, 0, 1, 1], [], []>} : vector<16x32xf32>, vector<32x32xf32>, vector<16x32xf32> -> vector<16x32xf32>
    %145 = arith.addf %140, %144 : vector<16x32xf32>
    %c5_146 = arith.constant 5 : index
    %c0_147 = arith.constant 0 : index
    %146 = vector.load %arg18[%c5_146, %c0_147] : memref<22x32xf32, #tpu.memory_space<vmem>>, vector<16x32xf32>
    %c5_148 = arith.constant 5 : index
    %c0_149 = arith.constant 0 : index
    %c0_150 = arith.constant 0 : index
    %147 = vector.load %arg9[%c5_148, %c0_149, %c0_150] : memref<7x32x32xf32, #tpu.memory_space<vmem>>, vector<1x32x32xf32>
    %148 = vector.shape_cast %147 : vector<1x32x32xf32> to vector<32x32xf32>
    %cst_151 = arith.constant dense<0.000000e+00> : vector<16x32xf32>
    %149 = tpu.matmul %146, %148, %cst_151 {dimension_numbers = #tpu.dot_dimension_numbers<[1], [0], [0], [1], [0, 0, 1, 1], [], []>} : vector<16x32xf32>, vector<32x32xf32>, vector<16x32xf32> -> vector<16x32xf32>
    %150 = arith.addf %145, %149 : vector<16x32xf32>
    %c6_152 = arith.constant 6 : index
    %c0_153 = arith.constant 0 : index
    %151 = vector.load %arg18[%c6_152, %c0_153] : memref<22x32xf32, #tpu.memory_space<vmem>>, vector<16x32xf32>
    %c6_154 = arith.constant 6 : index
    %c0_155 = arith.constant 0 : index
    %c0_156 = arith.constant 0 : index
    %152 = vector.load %arg9[%c6_154, %c0_155, %c0_156] : memref<7x32x32xf32, #tpu.memory_space<vmem>>, vector<1x32x32xf32>
    %153 = vector.shape_cast %152 : vector<1x32x32xf32> to vector<32x32xf32>
    %cst_157 = arith.constant dense<0.000000e+00> : vector<16x32xf32>
    %154 = tpu.matmul %151, %153, %cst_157 {dimension_numbers = #tpu.dot_dimension_numbers<[1], [0], [0], [1], [0, 0, 1, 1], [], []>} : vector<16x32xf32>, vector<32x32xf32>, vector<16x32xf32> -> vector<16x32xf32>
    %155 = arith.addf %150, %154 : vector<16x32xf32>
    %c0_158 = arith.constant 0 : index
    %c0_159 = arith.constant 0 : index
    %156 = vector.load %arg10[%c0_158, %c0_159] : memref<1x32xf32, #tpu.memory_space<vmem>>, vector<1x32xf32>
    %157 = vector.broadcast %156 : vector<1x32xf32> to vector<16x32xf32>
    %158 = arith.addf %155, %157 : vector<16x32xf32>
    %159 = arith.negf %158 : vector<16x32xf32>
    %160 = math.exp %159 : vector<16x32xf32>
    %cst_160 = arith.constant 1.000000e+00 : f32
    %161 = vector.broadcast %cst_160 : f32 to vector<16x32xf32>
    %162 = arith.addf %161, %160 : vector<16x32xf32>
    %163 = arith.divf %161, %162 : vector<16x32xf32>
    %c0_161 = arith.constant 0 : index
    %c0_162 = arith.constant 0 : index
    %164 = vector.load %arg11[%c0_161, %c0_162] : memref<32x128xf32, #tpu.memory_space<vmem>>, vector<32x128xf32>
    %cst_163 = arith.constant dense<0.000000e+00> : vector<16x128xf32>
    %165 = tpu.matmul %163, %164, %cst_163 {dimension_numbers = #tpu.dot_dimension_numbers<[1], [0], [0], [1], [0, 0, 1, 1], [], []>} : vector<16x32xf32>, vector<32x128xf32>, vector<16x128xf32> -> vector<16x128xf32>
    %166 = arith.mulf %87, %165 : vector<16x128xf32>
    %c0_164 = arith.constant 0 : index
    %c0_165 = arith.constant 0 : index
    %167 = vector.load %arg12[%c0_164, %c0_165] : memref<128x128xf32, #tpu.memory_space<vmem>>, vector<128x128xf32>
    %cst_166 = arith.constant dense<0.000000e+00> : vector<16x128xf32>
    %168 = tpu.matmul %166, %167, %cst_166 {dimension_numbers = #tpu.dot_dimension_numbers<[1], [0], [0], [1], [0, 0, 1, 1], [], []>} : vector<16x128xf32>, vector<128x128xf32>, vector<16x128xf32> -> vector<16x128xf32>
    %c0_167 = arith.constant 0 : index
    %c0_168 = arith.constant 0 : index
    %169 = vector.load %arg13[%c0_167, %c0_168] : memref<1x128xf32, #tpu.memory_space<vmem>>, vector<1x128xf32>
    %170 = vector.broadcast %169 : vector<1x128xf32> to vector<16x128xf32>
    %171 = arith.addf %168, %170 : vector<16x128xf32>
    %c0_169 = arith.constant 0 : index
    %c0_170 = arith.constant 0 : index
    %c0_171 = arith.constant 0 : index
    %172 = vector.load %arg14[%c0_169, %c0_170, %c0_171] : memref<1x16x128xf32, #tpu.memory_space<vmem>>, vector<1x16x128xf32>
    %173 = vector.shape_cast %172 : vector<1x16x128xf32> to vector<16x128xf32>
    %174 = vector.shape_cast %171 : vector<16x128xf32> to vector<1x16x128xf32>
    tpu.vector_store %arg14[%c0_169, %c0_170, %c0_171], %174 {strides = array<i32>} : memref<1x16x128xf32, #tpu.memory_space<vmem>>, vector<1x16x128xf32>,
    return
  }
  func.func @transform_0(%arg0: i32) -> (i32, i32, i32) {
    %c0_i32 = arith.constant 0 : i32
    %c0_i32_0 = arith.constant 0 : i32
    %c0_i32_1 = arith.constant 0 : i32
    return %arg0, %c0_i32, %c0_i32_0 : i32, i32, i32
  }
  func.func @transform_1(%arg0: i32) -> (i32, i32, i32) {
    %c0_i32 = arith.constant 0 : i32
    %c0_i32_0 = arith.constant 0 : i32
    %c0_i32_1 = arith.constant 0 : i32
    %c0_i32_2 = arith.constant 0 : i32
    return %c0_i32, %c0_i32_0, %c0_i32_1 : i32, i32, i32
  }
  func.func @transform_2(%arg0: i32) -> (i32, i32) {
    %c0_i32 = arith.constant 0 : i32
    %c0_i32_0 = arith.constant 0 : i32
    %c0_i32_1 = arith.constant 0 : i32
    return %c0_i32, %c0_i32_0 : i32, i32
  }
  func.func @transform_3(%arg0: i32) -> (i32, i32, i32) {
    %c0_i32 = arith.constant 0 : i32
    %c0_i32_0 = arith.constant 0 : i32
    %c0_i32_1 = arith.constant 0 : i32
    %c0_i32_2 = arith.constant 0 : i32
    return %c0_i32, %c0_i32_0, %c0_i32_1 : i32, i32, i32
  }
  func.func @transform_4(%arg0: i32) -> (i32, i32) {
    %c0_i32 = arith.constant 0 : i32
    %c0_i32_0 = arith.constant 0 : i32
    %c0_i32_1 = arith.constant 0 : i32
    return %c0_i32, %c0_i32_0 : i32, i32
  }
  func.func @transform_5(%arg0: i32) -> (i32, i32) {
    %c0_i32 = arith.constant 0 : i32
    %c0_i32_0 = arith.constant 0 : i32
    %c0_i32_1 = arith.constant 0 : i32
    return %c0_i32, %c0_i32_0 : i32, i32
  }
  func.func @transform_6(%arg0: i32) -> (i32, i32) {
    %c0_i32 = arith.constant 0 : i32
    %c0_i32_0 = arith.constant 0 : i32
    %c0_i32_1 = arith.constant 0 : i32
    return %c0_i32, %c0_i32_0 : i32, i32
  }
  func.func @transform_7(%arg0: i32) -> (i32, i32) {
    %c0_i32 = arith.constant 0 : i32
    %c0_i32_0 = arith.constant 0 : i32
    %c0_i32_1 = arith.constant 0 : i32
    return %c0_i32, %c0_i32_0 : i32, i32
  }
  func.func @transform_8(%arg0: i32) -> (i32, i32, i32) {
    %c0_i32 = arith.constant 0 : i32
    %c0_i32_0 = arith.constant 0 : i32
    %c0_i32_1 = arith.constant 0 : i32
    %c0_i32_2 = arith.constant 0 : i32
    return %c0_i32, %c0_i32_0, %c0_i32_1 : i32, i32, i32
  }
  func.func @transform_9(%arg0: i32) -> (i32, i32) {
    %c0_i32 = arith.constant 0 : i32
    %c0_i32_0 = arith.constant 0 : i32
    %c0_i32_1 = arith.constant 0 : i32
    return %c0_i32, %c0_i32_0 : i32, i32
  }
  func.func @transform_10(%arg0: i32) -> (i32, i32) {
    %c0_i32 = arith.constant 0 : i32
    %c0_i32_0 = arith.constant 0 : i32
    %c0_i32_1 = arith.constant 0 : i32
    return %c0_i32, %c0_i32_0 : i32, i32
  }
  func.func @transform_11(%arg0: i32) -> (i32, i32) {
    %c0_i32 = arith.constant 0 : i32
    %c0_i32_0 = arith.constant 0 : i32
    %c0_i32_1 = arith.constant 0 : i32
    return %c0_i32, %c0_i32_0 : i32, i32
  }
  func.func @transform_12(%arg0: i32) -> (i32, i32) {
    %c0_i32 = arith.constant 0 : i32
    %c0_i32_0 = arith.constant 0 : i32
    %c0_i32_1 = arith.constant 0 : i32
    return %c0_i32, %c0_i32_0 : i32, i32
  }
  func.func @transform_13(%arg0: i32) -> (i32, i32, i32) {
    %c0_i32 = arith.constant 0 : i32
    %c0_i32_0 = arith.constant 0 : i32
    %c0_i32_1 = arith.constant 0 : i32
    return %arg0, %c0_i32, %c0_i32_0 : i32, i32, i32
  }
}

</mosaic_0001>

<bundles_post_ra>
// kernel: tile.18
= control target key start
LH: loop header
LB: loop body
LE: loop exit
PB: predicated region body
PF: predicated region fallthrough
CT: control target
= control target key end

     0   :  { %s28_s0 = inlined_call_operand.vmem [shape: f32[8], index: 0, kind: input, shape index: {}]   ;;  %s29_s1 = inlined_call_operand.vmem [shape: f32[16,8], index: 1, kind: output, shape index: {}]  }
   0x1   :  { %v4_v0 = vld [vmem:[%s28_s0] ss:$0 sm:$0xff] }
   0x2   :  { %5 = vst [vmem:[%s29_s1] sm:$0xff] %v4_v0  ;;  %8 = vst [vmem:[%s29_s1 + $0x8] sm:$0xff] %v4_v0 }

// kernel: tile.19
= control target key start
LH: loop header
LB: loop body
LE: loop exit
PB: predicated region body
PF: predicated region fallthrough
CT: control target
= control target key end

     0   :  { %s167_s10 = smov 120   ;;  %s168_s11 = smov 104   ;;  %vm4_vm0 = vcmask 64512   ;;  %s253_s0 = inlined_call_operand.vmem [shape: f32[16,8], index: 0, kind: input, shape index: {}]   ;;  %s254_s1 = inlined_call_operand.hbm [shape: f32[1,128], index: 1, kind: output, shape index: {}]  }
   0x1   :  { %v112_v0 = vld [vmem:[%s253_s0 + $0xf] sm:$0x1]   ;;  %v114_v1 = vld [vmem:[%s253_s0 + $0xd] sm:$0x1]   ;;  %v113_v2 = vld [vmem:[%s253_s0 + $0xe] sm:$0x1]  }
   0x2   :  { %8 = vrot.lane.b32.xlu0 %v112_v0, %s167_s10  ;;  %20 = vrot.lane.b32.xlu1 %v114_v1, %s168_s11  ;;  %v115_v3 = vld [vmem:[%s253_s0 + $0xc] sm:$0x1]   ;;  %s169_s16 = smov 112   ;;  %s170_s17 = smov 96   ;;  %v116_v4 = vld [vmem:[%s253_s0 + $0xb] sm:$0x1]  }
   0x3   :  { %v117_v5 = vld [vmem:[%s253_s0 + $0xa] sm:$0x1]   ;;  %v3_v6 = vld [vmem:[%s253_s0] sm:$0x1]  }
   0x6   :  { %14 = vrot.lane.b32.xlu0 %v113_v2, %s169_s16  ;;  %26 = vrot.lane.b32.xlu1 %v115_v3, %s170_s17 }
   0x7   :  { %2 = vsyncpa [#allocation1], 0  ;;  %s171_s24 = smov 88   ;;  %s172_s25 = smov 80   ;;  %5 = vst.msk [vmem:[#allocation2] sm:$0x1] %vm4_vm0, %v3_v6  }
   0x8   :  { %v118_v7 = vld [vmem:[%s253_s0 + $0x9] sm:$0x1]   ;;  %v119_v8 = vld [vmem:[%s253_s0 + $0x8] sm:$0x1]   ;;  %s173_s30 = smov 72   ;;  %s174_s2 = smov 64  }
   0x9   :  { %v120_v9 = vld [vmem:[%s253_s0 + $0x7] sm:$0x1]   ;;  %v121_v10 = vld [vmem:[%s253_s0 + $0x6] sm:$0x1]   ;;  %s175_s7 = smov 56   ;;  %s176_s8 = smov 48  }
   0xa   :  { %32 = vrot.lane.b32.xlu0 %v116_v4, %s171_s24  ;;  %38 = vrot.lane.b32.xlu1 %v117_v5, %s172_s25  ;;  %v122_v11 = vld [vmem:[%s253_s0 + $0x5] sm:$0x1]   ;;  %v123_v12 = vld [vmem:[%s253_s0 + $0x4] sm:$0x1]   ;;  %s177_s13 = smov 40   ;;  %s178_s14 = smov 32  }
   0xb   :  { %v124_v13 = vld [vmem:[%s253_s0 + $0x3] sm:$0x1]   ;;  %v125_v14 = vld [vmem:[%s253_s0 + $0x2] sm:$0x1]   ;;  %s179_s19 = smov 24   ;;  %s180_s20 = smov 16  }
   0xc   :  { %v126_v15 = vld [vmem:[%s253_s0 + $0x1] sm:$0x1]   ;;  %s181_s0 = smov 8   ;;  %vm10_vm1 = vcmask 1048512   ;;  %vm16_vm2 = vcmask 982912   ;;  %vm22_vm3 = vcmask 917312  }
   0xd   :  { %vm28_vm4 = vcmask 851712   ;;  %vm34_vm5 = vcmask 786112   ;;  %vm40_vm6 = vcmask 720512   ;;  %vm46_vm7 = vcmask 654912   ;;  %s182_s23 = smov [#allocation0]  }
   0xe   :  { %44 = vrot.lane.b32.xlu0 %v118_v7, %s173_s30  ;;  %50 = vrot.lane.b32.xlu1 %v119_v8, %s174_s2  ;;  %vm52_vm8 = vcmask 589312   ;;  %vm58_vm9 = vcmask 523712   ;;  %vm64_vm10 = vcmask 458112   ;;  %vm70_vm11 = vcmask 392512   ;;  %s106_s24 = sshll.u32 %s182_s23, 4  ;;  %s107_s24 = int_to_ptr.vmem [resolvable:$true] %s106_s24 }
   0xf   :  { %vm76_vm12 = vcmask 326912   ;;  %vm82_vm13 = vcmask 261312   ;;  %vm88_vm14 = vcmask 195712   ;;  %vm94_vm15 = vcmask 130112   ;;  %s143_s25 = scalar_lea.vmem %s107_s24, 16  ;;  %s147_s26 = scalar_lea.vmem %s107_s24, 32 }
  0x10   :  { %p144_p0 = scmp.ne.s32.totalorder %s107_s24, %s143_s25  ;;  %p148_p1 = scmp.lt.s32.totalorder %s107_s24, %s107_s24 }
  0x11   :  { %p149_p2 = scmp.lt.s32.totalorder %s147_s26, %s143_s25 }
  0x12   :  { %56 = vrot.lane.b32.xlu0 %v120_v9, %s175_s7  ;;  %62 = vrot.lane.b32.xlu1 %v121_v10, %s176_s8 }
  0x13   :  { %p150_p3 = por %p149_p2, %p148_p1 }
  0x15   :  { %p151_p4 = pnand %p150_p3, %p144_p0 }
  0x16   :  { %68 = vrot.lane.b32.xlu0 %v122_v11, %s177_s13  ;;  %74 = vrot.lane.b32.xlu1 %v123_v12, %s178_s14 }
  0x1a   :  { %80 = vrot.lane.b32.xlu0 %v124_v13, %s179_s19  ;;  %86 = vrot.lane.b32.xlu1 %v125_v14, %s180_s20 }
  0x1e   :  { %92 = vrot.lane.b32.xlu0 %v126_v15, %s181_s0 }
  0x74   :  { %v9_v16 = vpop.permute.xlu0 %8   ;;  %v21_v17 = vpop.permute.xlu1 %20  }
  0x75   :  { %11 = vst.msk [vmem:[#allocation2] sm:$0x1] %vm10_vm1, %v9_v16  }
  0x78   :  { %v15_v18 = vpop.permute.xlu0 %14   ;;  %v27_v19 = vpop.permute.xlu1 %26  }
  0x79   :  { %17 = vst.msk [vmem:[#allocation2] sm:$0x1] %vm16_vm2, %v15_v18  }
  0x7a   :  { %23 = vst.msk [vmem:[#allocation2] sm:$0x1] %vm22_vm3, %v21_v17  }
  0x7b   :  { %29 = vst.msk [vmem:[#allocation2] sm:$0x1] %vm28_vm4, %v27_v19  }
  0x7c   :  { %v33_v20 = vpop.permute.xlu0 %32   ;;  %v39_v21 = vpop.permute.xlu1 %38  }
  0x7d   :  { %35 = vst.msk [vmem:[#allocation2] sm:$0x1] %vm34_vm5, %v33_v20  }
  0x7e   :  { %41 = vst.msk [vmem:[#allocation2] sm:$0x1] %vm40_vm6, %v39_v21  }
  0x80   :  { %v45_v22 = vpop.permute.xlu0 %44   ;;  %v51_v23 = vpop.permute.xlu1 %50  }
  0x81   :  { %47 = vst.msk [vmem:[#allocation2] sm:$0x1] %vm46_vm7, %v45_v22  }
  0x82   :  { %53 = vst.msk [vmem:[#allocation2] sm:$0x1] %vm52_vm8, %v51_v23  }
  0x84   :  { %v57_v24 = vpop.permute.xlu0 %56   ;;  %v63_v25 = vpop.permute.xlu1 %62  }
  0x85   :  { %59 = vst.msk [vmem:[#allocation2] sm:$0x1] %vm58_vm9, %v57_v24  }
  0x86   :  { %65 = vst.msk [vmem:[#allocation2] sm:$0x1] %vm64_vm10, %v63_v25  }
  0x88   :  { %v69_v26 = vpop.permute.xlu0 %68   ;;  %v75_v27 = vpop.permute.xlu1 %74  }
  0x89   :  { %71 = vst.msk [vmem:[#allocation2] sm:$0x1] %vm70_vm11, %v69_v26  }
  0x8a   :  { %77 = vst.msk [vmem:[#allocation2] sm:$0x1] %vm76_vm12, %v75_v27  }
  0x8c   :  { %v81_v28 = vpop.permute.xlu0 %80   ;;  %v87_v29 = vpop.permute.xlu1 %86  }
  0x8d   :  { %83 = vst.msk [vmem:[#allocation2] sm:$0x1] %vm82_vm13, %v81_v28  }
  0x8e   :  { %89 = vst.msk [vmem:[#allocation2] sm:$0x1] %vm88_vm14, %v87_v29  }
  0x90   :  { %v93_v30 = vpop.permute.xlu0 %92  }
  0x91   :  { %95 = vst.msk [vmem:[#allocation2] sm:$0x1] %vm94_vm15, %v93_v30  }
  0x98   :  { %v99_v31 = vld [vmem:[#allocation2] sm:$0x1] }
  0x99   :  { %101 = vst [vmem:[#allocation0] sm:$0x1] %v99_v31 }
  0x9a   :  { %154 = shalt.err (!%p151_p4)
}
  0x9b   :  { %s155_s29 = scalar_lea.hbm %s254_s1, 16 }
  0x9c   :  { %p156_p5 = scmp.ne.s32.totalorder %s254_s1, %s155_s29  ;;  %p159_p6 = scmp.lt.u32.totalorder %s155_s29, %s254_s1 }
  0x9e   :  { %p161_p7 = pnand %p159_p6, %p156_p5 }
  0xa0   :  { %164 = shalt.err (!%p161_p7)
}
  0xa1   :  { %109 = dma.vmem_to_hbm [thread:$0]  %s107_s24, 16, %s254_s1, [#allocation1]  }
  0xa2   :  { %165 = dma.done.wait [#allocation1], 16  }
  0xa3   :  { %166 = vsyncadd [#allocation1], 4294967280 }
  0xa4   :  { %111 = vsyncpa [#allocation1], 1 }

// kernel: lsk_forward.1
= control target key start
LH: loop header
LB: loop body
LE: loop exit
PB: predicated region body
PF: predicated region fallthrough
CT: control target
= control target key end

     0   :  { %s5183_s0 = inlined_call_operand.vmem [shape: f32[4,16,128], index: 0, kind: input, shape index: {}]   ;;  %s5184_s1 = inlined_call_operand.hbm [shape: f32[5,128,128], index: 1, kind: input, shape index: {}]   ;;  %s5185_s2 = inlined_call_operand.vmem [shape: f32[1,128], index: 2, kind: input, shape index: {}]   ;;  %s5186_s3 = inlined_call_operand.hbm [shape: f32[7,128,128], index: 3, kind: input, shape index: {}]   ;;  %s5187_s4 = inlined_call_operand.vmem [shape: f32[1,128], index: 4, kind: input, shape index: {}]   ;;  %s5188_s5 = inlined_call_operand.hbm [shape: f32[128,128], index: 5, kind: input, shape index: {}]   ;;  %s5189_s6 = inlined_call_operand.hbm [shape: f32[128,128], index: 6, kind: input, shape index: {}]   ;;  %s5190_s7 = inlined_call_operand.vmem [shape: f32[1,128], index: 7, kind: input, shape index: {}]   ;;  %s5191_s8 = inlined_call_operand.vmem [shape: f32[7,32,32], index: 8, kind: input, shape index: {}]   ;;  %s5192_s9 = inlined_call_operand.vmem [shape: f32[1,32], index: 9, kind: input, shape index: {}]   ;;  %s5193_s10 = inlined_call_operand.vmem [shape: f32[32,128], index: 10, kind: input, shape index: {}]   ;;  %s5194_s11 = inlined_call_operand.hbm [shape: f32[128,128], index: 11, kind: input, shape index: {}]   ;;  %s5195_s12 = inlined_call_operand.vmem [shape: f32[1,128], index: 12, kind: input, shape index: {}]   ;;  %s5196_s13 = inlined_call_operand.vmem [shape: f32[4,16,128], index: 13, kind: output, shape index: {}]  }
   0x1   :  { %5200 = sst [smem:[#allocation18_spill]] %s5195_s12 }
   0x2   :  { %5201 = sst [smem:[#allocation19_spill]] %s5196_s13 }
   0x3   :  { %18 = vsyncpa [#allocation7], 0 }
   0x4   :  { %19 = vsyncpa [#allocation9], 0 }
   0x5   :  { %20 = vsyncpa [#allocation12], 0  ;;  %s4813_s25 = smov 0  }
   0x6 LB: > { %5202 = sst [smem:[#allocation17_spill]] %s4726_s25  ;;  %s4819_s26 = sadd.s32 4294967295, %s4726_s25   ;;  %s4726_s25 = sphi %s4813_s25, %s26_s25  }
   0x7   : > { %p2913_p0 = scmp.ge.s32.totalorder %s4726_s25, 1  ;;  %p335_p1 = scmp.lt.s32.totalorder %s4726_s25, 5 }
   0x8   : > { %p5198_p2 = scmp.eq.s32.totalorder %s4819_s26, 0  ;;  %s4728_s28 = smov [#allocation8]  }
   0x9   : > { %p4824_p3 = pnand %p2913_p0, %p335_p1  ;;  %s363_s29 = sshll.u32 %s4728_s28, 4  ;;  %s4828_s29 = int_to_ptr.vmem [resolvable:$true] %s363_s29 }
   0xa   : > { %s4729_s30 = smov [#allocation11]   ;;  %s4730_s16 = smov [#allocation6]  }
   0xb   : > { %s5203_s27 = scalar_select %p4824_p3, 1, 0 }
   0xc   : > { %p4510_p4 = pneg %p4824_p3  ;;  %s392_s14 = sshll.u32 %s4729_s30, 4  ;;  %s4832_s14 = int_to_ptr.vmem [resolvable:$true] %s392_s14 }
   0xd   : > { %s347_s17 = sshll.u32 %s4730_s16, 4  ;;  %s4731_s18 = smov [#allocation10]   ;;  %s4840_s17 = int_to_ptr.vmem [resolvable:$true] %s347_s17 }
   0xe   : > { %p4836_p5 = pnand %p5198_p2, %p4510_p4  ;;  %s4842_s19 = sshll.u32 %s4731_s18, 4  ;;  %s380_s19 = int_to_ptr.vmem [resolvable:$true] %s4842_s19 }
   0xf   : > { %s4568_s22 = scalar_lea.hbm %s5186_s3, 14336 }
  0x10   : > { %p4569_p6 = scmp.ne.s32.totalorder %s5186_s3, %s4568_s22  ;;  %p4852_p7 = pneg %p4836_p5 }
  0x11   : > { %p4575_p10 = scmp.lt.u32.totalorder %s4568_s22, %s5186_s3 }
  0x12   : > { %p4571_p8 = pnand %p4852_p7, %p4569_p6 }
  0x14   : > { %p4572_p9 = pneg %p4571_p8 }
  0x16   : > { %p4577_p11 = pnand %p4575_p10, %p4572_p9 }
  0x18   : > { %4580 = shalt.err (!%p4577_p11)
}
  0x19   : > { %s4581_s18 = scalar_lea.vmem %s4828_s29, 14336  ;;  %p4589_p1 = scmp.lt.s32.totalorder %s4828_s29, %s4828_s29 }
  0x1a   : > { %p4582_p12 = scmp.ne.s32.totalorder %s4828_s29, %s4581_s18  ;;  %p4590_p4 = scmp.lt.s32.totalorder %s4581_s18, %s4581_s18 }
  0x1c   : > { %p4584_p13 = pnand %p4582_p12, %p4852_p7  ;;  %p4591_p6 = por %p4590_p4, %p4589_p1 }
  0x1e   : > { %p4585_p0 = pneg %p4584_p13 }
  0x20   : > { %p4592_p8 = pnand %p4591_p6, %p4585_p0 }
  0x22   : > { %4595 = shalt.err (!%p4592_p8)
}
  0x23   : > { %s4732_s20 = smov 128   ;;  %s4733_s21 = smov 8  }
  0x24   : > { %4516 = dma.hbm_to_vmem [thread:$0]  (!%p4836_p5), %s5186_s3, 14336, %s4828_s29, [#allocation9], %s4732_s20, %s4732_s20, %s4733_s21  }
  0x25   : > { %s4596_s16 = scalar_lea.hbm %s5189_s6, 2048 }
  0x26   : > { %p4597_p9 = scmp.ne.s32.totalorder %s5189_s6, %s4596_s16  ;;  %p4603_p12 = scmp.lt.u32.totalorder %s4596_s16, %s5189_s6 }
  0x28   : > { %p4599_p10 = pnand %p4597_p9, %p4852_p7 }
  0x2a   : > { %p4600_p11 = pneg %p4599_p10 }
  0x2c   : > { %p4605_p13 = pnand %p4603_p12, %p4600_p11 }
  0x2e   : > { %4608 = shalt.err (!%p4605_p13)
}
  0x2f   : > { %s4609_s29 = scalar_lea.vmem %s4832_s14, 2048  ;;  %p4617_p6 = scmp.lt.s32.totalorder %s4832_s14, %s4832_s14 }
  0x30   : > { %p4610_p0 = scmp.ne.s32.totalorder %s4832_s14, %s4609_s29  ;;  %p4618_p8 = scmp.lt.s32.totalorder %s4609_s29, %s4609_s29 }
  0x32   : > { %p4612_p1 = pnand %p4610_p0, %p4852_p7  ;;  %p4619_p9 = por %p4618_p8, %p4617_p6 }
  0x34   : > { %p4613_p4 = pneg %p4612_p1 }
  0x36   : > { %p4620_p10 = pnand %p4619_p9, %p4613_p4 }
  0x38   : > { %4623 = shalt.err (!%p4620_p10)
}
  0x39   : > { %4522 = dma.hbm_to_vmem [thread:$0]  (!%p4836_p5), %s5189_s6, 2048, %s4832_s14, [#allocation12], %s4732_s20, %s4732_s20, %s4733_s21  }
  0x3a   : > { %s4624_s23 = scalar_lea.hbm %s5184_s1, 10240 }
  0x3b   : > { %p4625_p11 = scmp.ne.s32.totalorder %s5184_s1, %s4624_s23  ;;  %p4631_p0 = scmp.lt.u32.totalorder %s4624_s23, %s5184_s1 }
  0x3d   : > { %p4627_p12 = pnand %p4625_p11, %p4852_p7 }
  0x3f   : > { %p4628_p13 = pneg %p4627_p12 }
  0x41   : > { %p4633_p1 = pnand %p4631_p0, %p4628_p13 }
  0x43   : > { %4636 = shalt.err (!%p4633_p1)
}
  0x44   : > { %s4637_s14 = scalar_lea.vmem %s4840_s17, 10240  ;;  %p4645_p9 = scmp.lt.s32.totalorder %s4840_s17, %s4840_s17 }
  0x45   : > { %p4638_p4 = scmp.ne.s32.totalorder %s4840_s17, %s4637_s14  ;;  %p4646_p10 = scmp.lt.s32.totalorder %s4637_s14, %s4637_s14 }
  0x47   : > { %p4640_p6 = pnand %p4638_p4, %p4852_p7  ;;  %p4647_p11 = por %p4646_p10, %p4645_p9 }
  0x49   : > { %p4641_p8 = pneg %p4640_p6 }
  0x4b   : > { %p4648_p12 = pnand %p4647_p11, %p4641_p8 }
  0x4d   : > { %4651 = shalt.err (!%p4648_p12)
}
  0x4e   : > { %4513 = dma.hbm_to_vmem [thread:$0]  (!%p4836_p5), %s5184_s1, 10240, %s4840_s17, [#allocation7], %s4732_s20, %s4732_s20, %s4733_s21  }
  0x4f   : > { %s4652_s22 = scalar_lea.hbm %s5188_s5, 2048 }
  0x50   : > { %p4653_p13 = scmp.ne.s32.totalorder %s5188_s5, %s4652_s22  ;;  %p4659_p4 = scmp.lt.u32.totalorder %s4652_s22, %s5188_s5 }
  0x52   : > { %p4655_p0 = pnand %p4653_p13, %p4852_p7 }
  0x54   : > { %p4656_p1 = pneg %p4655_p0 }
  0x56   : > { %p4661_p6 = pnand %p4659_p4, %p4656_p1 }
  0x58   : > { %4664 = shalt.err (!%p4661_p6)
}
  0x59   : > { %s4665_s18 = scalar_lea.vmem %s380_s19, 2048  ;;  %p4673_p11 = scmp.lt.s32.totalorder %s380_s19, %s380_s19 }
  0x5a   : > { %p4666_p8 = scmp.ne.s32.totalorder %s380_s19, %s4665_s18  ;;  %p4674_p12 = scmp.lt.s32.totalorder %s4665_s18, %s4665_s18 }
  0x5c   : > { %p4668_p9 = pnand %p4666_p8, %p4852_p7  ;;  %p4675_p2 = por %p4674_p12, %p4673_p11 }
  0x5e   : > { %p4669_p10 = pneg %p4668_p9 }
  0x60   : > { %p4676_p3 = pnand %p4675_p2, %p4669_p10 }
  0x62   : > { %4679 = shalt.err (!%p4676_p3)
}
  0x63   : > { %4519 = dma.hbm_to_vmem [thread:$0]  (!%p4836_p5), %s5188_s5, 2048, %s380_s19, [#allocation9], %s4732_s20, %s4732_s20, %s4733_s21  }
  0x64   : > { %s4734_s29 = smov [#allocation13]   ;;  %s4680_s22 = scalar_lea.hbm %s5194_s11, 2048 }
  0x65   : > { %s417_s12 = sshll.u32 %s4734_s29, 4  ;;  %p4681_p2 = scmp.ne.s32.totalorder %s5194_s11, %s4680_s22  ;;  %s418_s12 = int_to_ptr.vmem [resolvable:$true] %s417_s12 }
  0x66   : > { %p4687_p0 = scmp.lt.u32.totalorder %s4680_s22, %s5194_s11 }
  0x67   : > { %p4683_p3 = pnand %p4681_p2, %p4852_p7 }
  0x69   : > { %p4684_p13 = pneg %p4683_p3 }
  0x6b   : > { %p4689_p1 = pnand %p4687_p0, %p4684_p13 }
  0x6d   : > { %4692 = shalt.err (!%p4689_p1)
}
  0x6e   : > { %s4693_s19 = scalar_lea.vmem %s418_s12, 2048  ;;  %p4701_p9 = scmp.lt.s32.totalorder %s418_s12, %s418_s12 }
  0x6f   : > { %p4694_p4 = scmp.ne.s32.totalorder %s418_s12, %s4693_s19  ;;  %p4702_p10 = scmp.lt.s32.totalorder %s4693_s19, %s4693_s19 }
  0x71   : > { %p4696_p6 = pnand %p4694_p4, %p4852_p7  ;;  %p4703_p11 = por %p4702_p10, %p4701_p9 }
  0x73   : > { %p4697_p8 = pneg %p4696_p6 }
  0x75   : > { %p4704_p12 = pnand %p4703_p11, %p4697_p8 }
  0x77   : > { %4707 = shalt.err (!%p4704_p12)
}
  0x78   : > { %4525 = dma.hbm_to_vmem [thread:$0]  (!%p4836_p5), %s5194_s11, 2048, %s418_s12, [#allocation12], %s4732_s20, %s4732_s20, %s4733_s21  }
  0x79   : > { %p5206_p2 = scmp.ne.s32.totalorder %s5203_s27, 0 }
  0x7a   : > { %p5207_p7 = scmp.eq.s32.totalorder (!%p5206_p2), %s4819_s26, 0 }
  0x7b   : > { %444 = sbr.rel (%p5206_p2) target bundleno = 2161 (0x871), region = 72 }
  0x82   : > { %4713 = dma.done.wait (%p5207_p7), [#allocation7], 10240   ;;  %p5208_p3 = pmov %p5207_p7 }
  0x84   : > { %4715 = vsyncadd (%p5208_p3), [#allocation7], 4294957056  ;;  %p5209_p13 = pmov %p5208_p3 }
  0x85   : > { %p5210_p0 = pmov %p5208_p3 }
  0x86   : > { %4717 = dma.done.wait (%p5209_p13), [#allocation9], 16384  }
  0x87   : > { %4719 = vsyncadd (%p5210_p0), [#allocation9], 4294950912  ;;  %p5211_p1 = pmov %p5210_p0 }
  0x88   : > { %p5212_p5 = pmov %p5210_p0 }
  0x89   : > { %4721 = dma.done.wait (%p5211_p1), [#allocation12], 4096  }
  0x8a   : > { %4723 = vsyncadd (%p5212_p5), [#allocation12], 4294963200  ;;  %p504_p4 = scmp.lt.s32.totalorder %s4819_s26, 3  ;;  %v4735_v0 = vmov 0.0   ;;  %v541_v1 = vld [vmem:[#allocation6 + $0x80] sm:$0xff]  ;;  %v542_v2 = vld [vmem:[#allocation6 + $0x88] sm:$0xff] }
  0x8b   : > { %514 = vst [vmem:[#allocation2] sm:$0x3] %v4735_v0  ;;  %515 = vst [vmem:[#allocation2 + $0x12] sm:$0x3] %v4735_v0  ;;  %v543_v3 = vld [vmem:[#allocation6 + $0x90] sm:$0xff]  ;;  %v3912_v4 = vpack.c.bf16 %v542_v2, %v541_v1  ;;  %v544_v5 = vld [vmem:[#allocation6 + $0x98] sm:$0xff] }
  0x8c   : > { %1004 = vst [vmem:[#allocation3] sm:$0xff] %v4735_v0  ;;  %1005 = vst [vmem:[#allocation3 + $0x8] sm:$0x1] %v4735_v0  ;;  %s5217_s26 = smov (!%p504_p4, %s4819_s26), 3  ;;  %v3916_v6 = vpack.c.bf16 %v544_v5, %v543_v3  ;;  %v545_v7 = vld [vmem:[#allocation6 + $0xa0] sm:$0xff]  ;;  %v546_v8 = vld [vmem:[#allocation6 + $0xa8] sm:$0xff] }
  0x8d   : > { %1006 = vst [vmem:[#allocation3 + $0x19] sm:$0xff] %v4735_v0  ;;  %1007 = vst [vmem:[#allocation3 + $0x21] sm:$0x1] %v4735_v0  ;;  %s2979_s27 = sshll.u32 %s5217_s26, 4  ;;  %3913 = vmatprep.subr.bf16.mxu0 %v3912_v4  ;;  %v3920_v9 = vpack.c.bf16 %v546_v8, %v545_v7  ;;  %v547_v11 = vld [vmem:[#allocation6 + $0xb0] sm:$0xff]  ;;  %v548_v12 = vld [vmem:[#allocation6 + $0xb8] sm:$0xff] }
  0x8e   : > { %s508_s20 = scalar_lea.vmem %s5183_s0, %s2979_s27  ;;  %3915 = vmatpush3.bf16.msra.mxu0 %v3912_v4  ;;  %v3924_v14 = vpack.c.bf16 %v548_v12, %v547_v11  ;;  %v549_v15 = vld [vmem:[#allocation6 + $0xc0] sm:$0xff]  ;;  %v550_v16 = vld [vmem:[#allocation6 + $0xc8] sm:$0xff]  ;;  %v551_v19 = vld [vmem:[#allocation6 + $0xd0] sm:$0xff]  ;;  %s4736_s22 = smov 96   ;;  %vm1955_vm0 = vcmask 256000   ;;  %vm1958_vm1 = vcmask 130048  }
  0x8f   : > { %3917 = vmatprep.subr.bf16.mxu0 %v3916_v6  ;;  %v5001_v10 = vld [vmem:[%s508_s20] sm:$0xff]  ;;  %v5004_v13 = vld [vmem:[%s508_s20 + $0x8] sm:$0xff]  ;;  %v3928_v17 = vpack.c.bf16 %v550_v16, %v549_v15  ;;  %v553_v22 = vld [vmem:[#allocation6 + $0xe0] sm:$0xff]  ;;  %s4737_s23 = smov 112   ;;  %s4738_s24 = smov 80   ;;  %vm1969_vm2 = vcmask 261248  }
  0x90   : > { %518 = vst [vmem:[#allocation2 + $0x2] sm:$0xff] %v5001_v10  ;;  %519 = vst [vmem:[#allocation2 + $0xa] sm:$0xff] %v5004_v13  ;;  %v552_v20 = vld [vmem:[#allocation6 + $0xd8] sm:$0xff]  ;;  %v554_v23 = vld [vmem:[#allocation6 + $0xe8] sm:$0xff]  ;;  %s4739_s30 = smov 64   ;;  %s4740_s16 = smov 48  }
  0x91   : > { %v3932_v21 = vpack.c.bf16 %v552_v20, %v551_v19  ;;  %v3936_v24 = vpack.c.bf16 %v554_v23, %v553_v22  ;;  %v555_v25 = vld [vmem:[#allocation6 + $0xf0] sm:$0xff]  ;;  %v556_v26 = vld [vmem:[#allocation6 + $0xf8] sm:$0xff]  ;;  %v522_v28 = vld [vmem:[#allocation6] sm:$0xff]  ;;  %s4741_s19 = smov 32   ;;  %s4742_s18 = smov 16   ;;  %vm1985_vm3 = vcmask 261120  }
  0x92   : > { %3919 = vmatpush3.bf16.msra.mxu0 %v3916_v6  ;;  %v3940_v27 = vpack.c.bf16 %v556_v26, %v555_v25  ;;  %v523_v29 = vld [vmem:[#allocation6 + $0x8] sm:$0xff]  ;;  %v524_v31 = vld [vmem:[#allocation6 + $0x10] sm:$0xff]  ;;  %v525_v32 = vld [vmem:[#allocation6 + $0x18] sm:$0xff]  ;;  %s5213_s15 = sld [smem:[#allocation18_spill]]  ;;  %s5214_s21 = sld [smem:[#allocation19_spill]] }
  0x93   : > { %3921 = vmatprep.subr.bf16.mxu0 %v3920_v9  ;;  %v3944_v30 = vpack.c.bf16 %v523_v29, %v522_v28  ;;  %v3948_v34 = vpack.c.bf16 %v525_v32, %v524_v31  ;;  %v526_v36 = vld [vmem:[#allocation6 + $0x20] sm:$0xff]  ;;  %v527_v37 = vld [vmem:[#allocation6 + $0x28] sm:$0xff]  ;;  %v1033_v40 = vld [vmem:[#allocation8 + $0x90] sm:$0xff] }
  0x94   : > { %v1031_v38 = vld [vmem:[#allocation8 + $0x80] sm:$0xff]  ;;  %v1032_v39 = vld [vmem:[#allocation8 + $0x88] sm:$0xff]  ;;  %v1034_v42 = vld [vmem:[#allocation8 + $0x98] sm:$0xff]  ;;  %v3952_v43 = vpack.c.bf16 %v527_v37, %v526_v36 }
  0x95   : > { %v4072_v41 = vpack.c.bf16 %v1032_v39, %v1031_v38  ;;  %v4076_v44 = vpack.c.bf16 %v1034_v42, %v1033_v40  ;;  %v1035_v45 = vld [vmem:[#allocation8 + $0xa0] sm:$0xff]  ;;  %v1036_v46 = vld [vmem:[#allocation8 + $0xa8] sm:$0xff]  ;;  %v528_v47 = vld [vmem:[#allocation6 + $0x30] sm:$0xff] }
  0x96   : > { %3923 = vmatpush3.bf16.msra.mxu0 %v3920_v9  ;;  %v529_v48 = vld [vmem:[#allocation6 + $0x38] sm:$0xff]  ;;  %v4080_v49 = vpack.c.bf16 %v1036_v46, %v1035_v45  ;;  %v1037_v51 = vld [vmem:[#allocation8 + $0xb0] sm:$0xff]  ;;  %v530_v53 = vld [vmem:[#allocation6 + $0x40] sm:$0xff] }
  0x97   : > { %3925 = vmatprep.subr.bf16.mxu0 %v3924_v14  ;;  %v538_v18 = vld [vmem:[#allocation2 + $0x1] sm:$0xff]  ;;  %v539_v33 = vld [vmem:[#allocation2 + $0x9] sm:$0xff]  ;;  %4073 = vmatprep.subr.bf16.mxu1 %v4072_v41  ;;  %v3956_v50 = vpack.c.bf16 %v529_v48, %v528_v47  ;;  %v1039_v57 = vld [vmem:[#allocation8 + $0xc0] sm:$0xff] }
  0x98   : > { %3331 = vmatprep.mubr.f32.mxu0 %v538_v18  ;;  %v520_v35 = vld [vmem:[#allocation2] sm:$0xff]  ;;  %4075 = vmatpush3.bf16.msra.mxu1 %v4072_v41  ;;  %v1038_v52 = vld [vmem:[#allocation8 + $0xb8] sm:$0xff]  ;;  %v532_v59 = vld [vmem:[#allocation6 + $0x50] sm:$0xff]  ;;  %s513_s14 = scalar_lea.vmem %s5214_s21, %s2979_s27 }
  0x99   : > { %4077 = vmatprep.subr.bf16.mxu1 %v4076_v44  ;;  %v531_v54 = vld [vmem:[#allocation6 + $0x48] sm:$0xff]  ;;  %v4084_v55 = vpack.c.bf16 %v1038_v52, %v1037_v51  ;;  %v533_v60 = vld [vmem:[#allocation6 + $0x58] sm:$0xff]  ;;  %v534_v63 = vld [vmem:[#allocation6 + $0x60] sm:$0xff] }
  0x9a   : > { %3927 = vmatpush3.bf16.msra.mxu0 %v3924_v14  ;;  %v3960_v56 = vpack.c.bf16 %v531_v54, %v530_v53  ;;  %v1040_v58 = vld [vmem:[#allocation8 + $0xc8] sm:$0xff]  ;;  %v3964_v62 = vpack.c.bf16 %v533_v60, %v532_v59  ;;  %v536_v3 = vld [vmem:[#allocation6 + $0x70] sm:$0xff]  ;;  %v537_v4 = vld [vmem:[#allocation6 + $0x78] sm:$0xff] }
  0x9b   : > { %3929 = vmatprep.subr.bf16.mxu0 %v3928_v17  ;;  %v4088_v61 = vpack.c.bf16 %v1040_v58, %v1039_v57  ;;  %v535_v1 = vld [vmem:[#allocation6 + $0x68] sm:$0xff]  ;;  %v3972_v5 = vpack.c.bf16 %v537_v4, %v536_v3  ;;  %v710_v6 = vld [vmem:[#allocation6 + $0x100] sm:$0xff]  ;;  %v712_v9 = vld [vmem:[#allocation6 + $0x110] sm:$0xff] }
  0x9c   : > { %4079 = vmatpush3.bf16.msra.mxu1 %v4076_v44  ;;  %v3968_v2 = vpack.c.bf16 %v535_v1, %v534_v63  ;;  %v711_v7 = vld [vmem:[#allocation6 + $0x108] sm:$0xff]  ;;  %v713_v11 = vld [vmem:[#allocation6 + $0x118] sm:$0xff]  ;;  %v521_v12 = vld [vmem:[#allocation2 + $0x8] sm:$0xff] }
  0x9d   : > { %4081 = vmatprep.subr.bf16.mxu1 %v4080_v49  ;;  %v3976_v8 = vpack.c.bf16 %v711_v7, %v710_v6  ;;  %v3980_v14 = vpack.c.bf16 %v713_v11, %v712_v9  ;;  %v714_v15 = vld [vmem:[#allocation6 + $0x120] sm:$0xff]  ;;  %v715_v16 = vld [vmem:[#allocation6 + $0x128] sm:$0xff]  ;;  %v716_v18 = vld [vmem:[#allocation6 + $0x130] sm:$0xff] }
  0x9e   : > { %3931 = vmatpush3.bf16.msra.mxu0 %v3928_v17  ;;  %v3984_v17 = vpack.c.bf16 %v715_v16, %v714_v15  ;;  %v717_v19 = vld [vmem:[#allocation6 + $0x138] sm:$0xff]  ;;  %v719_v22 = vld [vmem:[#allocation6 + $0x148] sm:$0xff]  ;;  %v724_v29 = vld [vmem:[#allocation6 + $0x170] sm:$0xff] }
  0x9f   : > { %3933 = vmatprep.subr.bf16.mxu0 %v3932_v21  ;;  %v3988_v20 = vpack.c.bf16 %v717_v19, %v716_v18  ;;  %v721_v25 = vld [vmem:[#allocation6 + $0x158] sm:$0xff]  ;;  %v723_v28 = vld [vmem:[#allocation6 + $0x168] sm:$0xff]  ;;  %v806_v32 = vld [vmem:[#allocation6 + $0x180] sm:$0xff] }
  0xa0   : > { %4083 = vmatpush3.bf16.msra.mxu1 %v4080_v49  ;;  %v809_v36 = vld [vmem:[#allocation6 + $0x198] sm:$0xff]  ;;  %v803_v38 = vld [vmem:[#allocation2 + $0x3] sm:$0xff]  ;;  %v810_v39 = vld [vmem:[#allocation6 + $0x1a0] sm:$0xff] }
  0xa1   : > { %4085 = vmatprep.subr.bf16.mxu1 %v4084_v55  ;;  %v811_v40 = vld [vmem:[#allocation6 + $0x1a8] sm:$0xff]  ;;  %v812_v42 = vld [vmem:[#allocation6 + $0x1b0] sm:$0xff]  ;;  %v814_v45 = vld [vmem:[#allocation6 + $0x1c0] sm:$0xff] }
  0xa2   : > { %3935 = vmatpush3.bf16.msra.mxu0 %v3932_v21  ;;  %v718_v21 = vld [vmem:[#allocation6 + $0x140] sm:$0xff]  ;;  %v4016_v41 = vpack.c.bf16 %v811_v40, %v810_v39  ;;  %v815_v46 = vld [vmem:[#allocation6 + $0x1c8] sm:$0xff]  ;;  %v816_v48 = vld [vmem:[#allocation6 + $0x1d0] sm:$0xff] }
  0xa3   : > { %3937 = vmatprep.subr.bf16.mxu0 %v3936_v24  ;;  %v3992_v23 = vpack.c.bf16 %v719_v22, %v718_v21  ;;  %v4024_v47 = vpack.c.bf16 %v815_v46, %v814_v45  ;;  %v817_v49 = vld [vmem:[#allocation6 + $0x1d8] sm:$0xff]  ;;  %v819_v51 = vld [vmem:[#allocation6 + $0x1e8] sm:$0xff]  ;;  %v820_v53 = vld [vmem:[#allocation6 + $0x1f0] sm:$0xff] }
  0xa4   : > { %4087 = vmatpush3.bf16.msra.mxu1 %v4084_v55  ;;  %v821_v54 = vld [vmem:[#allocation6 + $0x1f8] sm:$0xff]  ;;  %v903_v57 = vld [vmem:[#allocation6 + $0x208] sm:$0xff]  ;;  %v904_v59 = vld [vmem:[#allocation6 + $0x210] sm:$0xff] }
  0xa5   : > { %4089 = vmatprep.subr.bf16.mxu1 %v4088_v61  ;;  %v4036_v55 = vpack.c.bf16 %v821_v54, %v820_v53  ;;  %v905_v60 = vld [vmem:[#allocation6 + $0x218] sm:$0xff]  ;;  %v899_v63 = vld [vmem:[#allocation2 + $0x4] sm:$0xff]  ;;  %v906_v1 = vld [vmem:[#allocation6 + $0x220] sm:$0xff] }
  0xa6   : > { %3939 = vmatpush3.bf16.msra.mxu0 %v3936_v24  ;;  %v720_v24 = vld [vmem:[#allocation6 + $0x150] sm:$0xff]  ;;  %v910_v7 = vld [vmem:[#allocation6 + $0x240] sm:$0xff]  ;;  %v915_v16 = vld [vmem:[#allocation6 + $0x268] sm:$0xff] }
  0xa7   : > { %3941 = vmatprep.subr.bf16.mxu0 %v3940_v27  ;;  %v3996_v26 = vpack.c.bf16 %v721_v25, %v720_v24  ;;  %v908_v4 = vld [vmem:[#allocation6 + $0x230] sm:$0xff]  ;;  %v914_v15 = vld [vmem:[#allocation6 + $0x260] sm:$0xff]  ;;  %v917_v19 = vld [vmem:[#allocation6 + $0x278] sm:$0xff] }
  0xa8   : > { %4091 = vmatpush3.bf16.msra.mxu1 %v4088_v61  ;;  %v804_v61 = vld [vmem:[#allocation2 + $0xb] sm:$0xff]  ;;  %v1043_v25 = vld [vmem:[#allocation8 + $0xe0] sm:$0xff] }
  0xa9   : > { %v912_v11 = vld [vmem:[#allocation6 + $0x250] sm:$0xff]  ;;  %v1015_v39 = vld [vmem:[#allocation8 + $0x18] sm:$0xff]  ;;  %v1024_v54 = vld [vmem:[#allocation8 + $0x60] sm:$0xff] }
  0xaa   : > { %3943 = vmatpush3.bf16.msra.mxu0 %v3940_v27  ;;  %v722_v27 = vld [vmem:[#allocation6 + $0x160] sm:$0xff]  ;;  %v916_v18 = vld [vmem:[#allocation6 + $0x270] sm:$0xff] }
  0xab   : > { %3945 = vmatprep.subr.bf16.mxu0 %v3944_v30  ;;  %v900_v21 = vld [vmem:[#allocation2 + $0xc] sm:$0xff] }
  0xac   : > { %v1041_v22 = vld [vmem:[#allocation8 + $0xd0] sm:$0xff] }
  0xad   : > { %3332 = vmatmul.mubr.f32.vlgmr.msra.gmra.mrb[0].mxu0 %v539_v33  ;;  %v807_v33 = vld [vmem:[#allocation6 + $0x188] sm:$0xff]  ;;  %v1018_v46 = vld [vmem:[#allocation8 + $0x30] sm:$0xff] }
  0xae   : > { %3947 = vmatpush3.bf16.msra.mxu0 %v3944_v30  ;;  %3366 = vmatprep.mubr.f32.mxu0 %v520_v35  ;;  %v725_v30 = vld [vmem:[#allocation6 + $0x178] sm:$0xff]  ;;  %v808_v35 = vld [vmem:[#allocation6 + $0x190] sm:$0xff] }
  0xaf   : > { %3949 = vmatprep.subr.bf16.mxu0 %v3948_v34  ;;  %v4004_v31 = vpack.c.bf16 %v725_v30, %v724_v29  ;;  %v4012_v37 = vpack.c.bf16 %v809_v36, %v808_v35  ;;  %v1012_v30 = vld [vmem:[#allocation8] sm:$0xff] }
  0xb2   : > { %3951 = vmatpush3.bf16.msra.mxu0 %v3948_v34  ;;  %v4008_v34 = vpack.c.bf16 %v807_v33, %v806_v32  ;;  %v2930_v33 = vld [vmem:[%s5185_s2] ss:$0 sm:$0xff] }
  0xb3   : > { %3953 = vmatprep.subr.bf16.mxu0 %v3952_v43 }
  0xb6   : > { %3955 = vmatpush3.bf16.msra.mxu0 %v3952_v43  ;;  %v813_v43 = vld [vmem:[#allocation6 + $0x1b8] sm:$0xff] }
  0xb7   : > { %3957 = vmatprep.subr.bf16.mxu0 %v3956_v50  ;;  %v4020_v44 = vpack.c.bf16 %v813_v43, %v812_v42  ;;  %v1016_v43 = vld [vmem:[#allocation8 + $0x20] sm:$0xff] }
  0xba   : > { %3959 = vmatpush3.bf16.msra.mxu0 %v3956_v50  ;;  %v4028_v50 = vpack.c.bf16 %v817_v49, %v816_v48  ;;  %v1020_v49 = vld [vmem:[#allocation8 + $0x40] sm:$0xff] }
  0xbb   : > { %3961 = vmatprep.subr.bf16.mxu0 %v3960_v56 }
  0xbe   : > { %3963 = vmatpush3.bf16.msra.mxu0 %v3960_v56  ;;  %v902_v56 = vld [vmem:[#allocation6 + $0x200] sm:$0xff] }
  0xbf   : > { %3965 = vmatprep.subr.bf16.mxu0 %v3964_v62  ;;  %v4040_v58 = vpack.c.bf16 %v903_v57, %v902_v56  ;;  %v1026_v56 = vld [vmem:[#allocation8 + $0x70] sm:$0xff]  ;;  %v1027_v57 = vld [vmem:[#allocation8 + $0x78] sm:$0xff] }
  0xc2   : > { %3967 = vmatpush3.bf16.msra.mxu0 %v3964_v62  ;;  %v4044_v62 = vpack.c.bf16 %v905_v60, %v904_v59  ;;  %v1200_v59 = vld [vmem:[#allocation8 + $0x100] sm:$0xff]  ;;  %v1201_v60 = vld [vmem:[#allocation8 + $0x108] sm:$0xff] }
  0xc3   : > { %3969 = vmatprep.subr.bf16.mxu0 %v3968_v2 }
  0xc6   : > { %3971 = vmatpush3.bf16.msra.mxu0 %v3968_v2  ;;  %v907_v2 = vld [vmem:[#allocation6 + $0x228] sm:$0xff] }
  0xc7   : > { %3973 = vmatprep.subr.bf16.mxu0 %v3972_v5  ;;  %v4048_v3 = vpack.c.bf16 %v907_v2, %v906_v1 }
  0xca   : > { %3975 = vmatpush3.bf16.msra.mxu0 %v3972_v5  ;;  %v909_v5 = vld [vmem:[#allocation6 + $0x238] sm:$0xff] }
  0xcb   : > { %3977 = vmatprep.subr.bf16.mxu0 %v3976_v8  ;;  %v4052_v6 = vpack.c.bf16 %v909_v5, %v908_v4  ;;  %v1205_v4 = vld [vmem:[#allocation8 + $0x128] sm:$0xff] }
  0xcd   : > { %3367 = vmatmul.mubr.f32.vlgmr.msra.gmra.mrb[0].mxu0 %v521_v12  ;;  %v913_v12 = vld [vmem:[#allocation6 + $0x258] sm:$0xff] }
  0xce   : > { %3979 = vmatpush3.bf16.msra.mxu0 %v3976_v8  ;;  %3401 = vmatprep.mubr.f32.mxu0 %v5001_v10  ;;  %v4000_v10 = vpack.c.bf16 %v723_v28, %v722_v27  ;;  %v911_v8 = vld [vmem:[#allocation6 + $0x248] sm:$0xff]  ;;  %v1045_v28 = vld [vmem:[#allocation8 + $0xf0] sm:$0xff] }
  0xcf   : > { %3981 = vmatprep.subr.bf16.mxu0 %v3980_v14  ;;  %v4056_v9 = vpack.c.bf16 %v911_v8, %v910_v7  ;;  %v1206_v7 = vld [vmem:[#allocation8 + $0x130] sm:$0xff]  ;;  %v1207_v8 = vld [vmem:[#allocation8 + $0x138] sm:$0xff] }
  0xd2   : > { %3983 = vmatpush3.bf16.msra.mxu0 %v3980_v14  ;;  %v4060_v14 = vpack.c.bf16 %v913_v12, %v912_v11  ;;  %v1208_v11 = vld [vmem:[#allocation8 + $0x140] sm:$0xff]  ;;  %v1209_v12 = vld [vmem:[#allocation8 + $0x148] sm:$0xff] }
  0xd3   : > { %3985 = vmatprep.subr.bf16.mxu0 %v3984_v17 }
  0xd6   : > { %3987 = vmatpush3.bf16.msra.mxu0 %v3984_v17  ;;  %v4064_v17 = vpack.c.bf16 %v915_v16, %v914_v15  ;;  %v1210_v15 = vld [vmem:[#allocation8 + $0x150] sm:$0xff]  ;;  %v1211_v16 = vld [vmem:[#allocation8 + $0x158] sm:$0xff] }
  0xd7   : > { %3989 = vmatprep.subr.bf16.mxu0 %v3988_v20 }
  0xda   : > { %3991 = vmatpush3.bf16.msra.mxu0 %v3988_v20  ;;  %v4068_v20 = vpack.c.bf16 %v917_v19, %v916_v18  ;;  %v1212_v18 = vld [vmem:[#allocation8 + $0x160] sm:$0xff]  ;;  %v1213_v19 = vld [vmem:[#allocation8 + $0x168] sm:$0xff] }
  0xdb   : > { %3993 = vmatprep.subr.bf16.mxu0 %v3992_v23 }
  0xde   : > { %3995 = vmatpush3.bf16.msra.mxu0 %v3992_v23  ;;  %v1042_v23 = vld [vmem:[#allocation8 + $0xd8] sm:$0xff] }
  0xdf   : > { %3997 = vmatprep.subr.bf16.mxu0 %v3996_v26  ;;  %v4092_v24 = vpack.c.bf16 %v1042_v23, %v1041_v22  ;;  %v1215_v22 = vld [vmem:[#allocation8 + $0x178] sm:$0xff] }
  0xe1   : > { %4093 = vmatprep.subr.bf16.mxu1 %v4092_v24 }
  0xe2   : > { %3999 = vmatpush3.bf16.msra.mxu0 %v3996_v26  ;;  %4095 = vmatpush3.bf16.msra.mxu1 %v4092_v24  ;;  %v1044_v26 = vld [vmem:[#allocation8 + $0xe8] sm:$0xff]  ;;  %v1296_v24 = vld [vmem:[#allocation8 + $0x180] sm:$0xff] }
  0xe3   : > { %4001 = vmatprep.subr.bf16.mxu0 %v4000_v10  ;;  %v4096_v27 = vpack.c.bf16 %v1044_v26, %v1043_v25  ;;  %v1297_v25 = vld [vmem:[#allocation8 + $0x188] sm:$0xff] }
  0xe4   : > { %v4168_v26 = vpack.c.bf16 %v1297_v25, %v1296_v24  ;;  %v1402_v24 = vld [vmem:[#allocation8 + $0x250] sm:$0xff]  ;;  %v1403_v25 = vld [vmem:[#allocation8 + $0x258] sm:$0xff] }
  0xe5   : > { %4097 = vmatprep.subr.bf16.mxu1 %v4096_v27 }
  0xe6   : > { %4003 = vmatpush3.bf16.msra.mxu0 %v4000_v10  ;;  %v1046_v10 = vld [vmem:[#allocation8 + $0xf8] sm:$0xff]  ;;  %4099 = vmatpush3.bf16.msra.mxu1 %v4096_v27  ;;  %v1298_v27 = vld [vmem:[#allocation8 + $0x190] sm:$0xff] }
  0xe7   : > { %4005 = vmatprep.subr.bf16.mxu0 %v4004_v31  ;;  %v4100_v29 = vpack.c.bf16 %v1046_v10, %v1045_v28  ;;  %v1299_v28 = vld [vmem:[#allocation8 + $0x198] sm:$0xff] }
  0xe8   : > { %v4172_v10 = vpack.c.bf16 %v1299_v28, %v1298_v27  ;;  %v1404_v27 = vld [vmem:[#allocation8 + $0x260] sm:$0xff]  ;;  %v1405_v28 = vld [vmem:[#allocation8 + $0x268] sm:$0xff] }
  0xe9   : > { %4101 = vmatprep.subr.bf16.mxu1 %v4100_v29 }
  0xea   : > { %4007 = vmatpush3.bf16.msra.mxu0 %v4004_v31  ;;  %4103 = vmatpush3.bf16.msra.mxu1 %v4100_v29  ;;  %v1013_v31 = vld [vmem:[#allocation8 + $0x8] sm:$0xff] }
  0xeb   : > { %4009 = vmatprep.subr.bf16.mxu0 %v4008_v34  ;;  %v4104_v32 = vpack.c.bf16 %v1013_v31, %v1012_v30  ;;  %v1300_v30 = vld [vmem:[#allocation8 + $0x1a0] sm:$0xff]  ;;  %v1301_v31 = vld [vmem:[#allocation8 + $0x1a8] sm:$0xff] }
  0xed   : > { %3402 = vmatmul.mubr.f32.vlgmr.msra.gmra.mrb[0].mxu0 %v5004_v13  ;;  %v818_v13 = vld [vmem:[#allocation6 + $0x1e0] sm:$0xff]  ;;  %4105 = vmatprep.subr.bf16.mxu1 %v4104_v32 }
  0xee   : > { %4011 = vmatpush3.bf16.msra.mxu0 %v4008_v34  ;;  %3436 = vmatprep.mubr.f32.mxu0 %v803_v38  ;;  %v4032_v52 = vpack.c.bf16 %v819_v51, %v818_v13  ;;  %v1014_v38 = vld [vmem:[#allocation8 + $0x10] sm:$0xff] }
  0xef   : > { %4013 = vmatprep.subr.bf16.mxu0 %v4012_v37  ;;  %v4108_v42 = vpack.c.bf16 %v1015_v39, %v1014_v38  ;;  %v1022_v51 = vld [vmem:[#allocation8 + $0x50] sm:$0xff]  ;;  %v1705_v38 = vld [vmem:[#allocation11 + $0x18] sm:$0xff]  ;;  %v4176_v39 = vpack.c.bf16 %v1301_v31, %v1300_v30 }
  0xf0   : > { %v1407_v30 = vld [vmem:[#allocation8 + $0x278] sm:$0xff] }
  0xf2   : > { %4015 = vmatpush3.bf16.msra.mxu0 %v4012_v37 }
  0xf3   : > { %4017 = vmatprep.subr.bf16.mxu0 %v4016_v41 }
  0xf6   : > { %4019 = vmatpush3.bf16.msra.mxu0 %v4016_v41 }
  0xf7   : > { %4021 = vmatprep.subr.bf16.mxu0 %v4020_v44 }
  0xfa   : > { %4023 = vmatpush3.bf16.msra.mxu0 %v4020_v44  ;;  %v1017_v44 = vld [vmem:[#allocation8 + $0x28] sm:$0xff] }
  0xfb   : > { %4025 = vmatprep.subr.bf16.mxu0 %v4024_v47  ;;  %v4112_v45 = vpack.c.bf16 %v1017_v44, %v1016_v43  ;;  %v1302_v43 = vld [vmem:[#allocation8 + $0x1b0] sm:$0xff]  ;;  %v1303_v44 = vld [vmem:[#allocation8 + $0x1b8] sm:$0xff] }
  0xfe   : > { %4027 = vmatpush3.bf16.msra.mxu0 %v4024_v47  ;;  %v1019_v47 = vld [vmem:[#allocation8 + $0x38] sm:$0xff] }
  0xff   : > { %4029 = vmatprep.subr.bf16.mxu0 %v4028_v50  ;;  %v4116_v48 = vpack.c.bf16 %v1019_v47, %v1018_v46  ;;  %v4180_v46 = vpack.c.bf16 %v1303_v44, %v1302_v43  ;;  %v1708_v47 = vld [vmem:[#allocation11 + $0x30] sm:$0xff] }
 0x102   : > { %4031 = vmatpush3.bf16.msra.mxu0 %v4028_v50  ;;  %v1021_v50 = vld [vmem:[#allocation8 + $0x48] sm:$0xff] }
 0x103   : > { %4033 = vmatprep.subr.bf16.mxu0 %v4032_v52  ;;  %v4120_v13 = vpack.c.bf16 %v1021_v50, %v1020_v49  ;;  %v1304_v49 = vld [vmem:[#allocation8 + $0x1c0] sm:$0xff]  ;;  %v1305_v50 = vld [vmem:[#allocation8 + $0x1c8] sm:$0xff] }
 0x106   : > { %4035 = vmatpush3.bf16.msra.mxu0 %v4032_v52  ;;  %v1023_v52 = vld [vmem:[#allocation8 + $0x58] sm:$0xff] }
 0x107   : > { %4037 = vmatprep.subr.bf16.mxu0 %v4036_v55  ;;  %v4124_v53 = vpack.c.bf16 %v1023_v52, %v1022_v51  ;;  %v4184_v51 = vpack.c.bf16 %v1305_v50, %v1304_v49  ;;  %v1710_v52 = vld [vmem:[#allocation11 + $0x40] sm:$0xff]  ;;  %v1497_v49 = vld [vmem:[#allocation8 + $0x2c8] sm:$0xff] }
 0x10a   : > { %4039 = vmatpush3.bf16.msra.mxu0 %v4036_v55  ;;  %v1025_v55 = vld [vmem:[#allocation8 + $0x68] sm:$0xff] }
 0x10b   : > { %4041 = vmatprep.subr.bf16.mxu0 %v4040_v58 }
 0x10d   : > { %3437 = vmatmul.mubr.f32.vlgmr.msra.gmra.mrb[0].mxu0 %v804_v61  ;;  %v4136_v61 = vpack.c.bf16 %v1201_v60, %v1200_v59  ;;  %v1308_v59 = vld [vmem:[#allocation8 + $0x1e0] sm:$0xff]  ;;  %v1309_v60 = vld [vmem:[#allocation8 + $0x1e8] sm:$0xff] }
 0x10e   : > { %4043 = vmatpush3.bf16.msra.mxu0 %v4040_v58  ;;  %3471 = vmatprep.mubr.f32.mxu0 %v899_v63  ;;  %v4132_v58 = vpack.c.bf16 %v1027_v57, %v1026_v56  ;;  %v1203_v63 = vld [vmem:[#allocation8 + $0x118] sm:$0xff]  ;;  %v1712_v57 = vld [vmem:[#allocation11 + $0x50] sm:$0xff] }
 0x10f   : > { %4045 = vmatprep.subr.bf16.mxu0 %v4044_v62 }
 0x112   : > { %4047 = vmatpush3.bf16.msra.mxu0 %v4044_v62  ;;  %v1202_v62 = vld [vmem:[#allocation8 + $0x110] sm:$0xff] }
 0x113   : > { %4049 = vmatprep.subr.bf16.mxu0 %v4048_v3  ;;  %v4140_v1 = vpack.c.bf16 %v1203_v63, %v1202_v62  ;;  %v4192_v62 = vpack.c.bf16 %v1309_v60, %v1308_v59  ;;  %v1714_v63 = vld [vmem:[#allocation11 + $0x60] sm:$0xff]  ;;  %v1585_v59 = vld [vmem:[#allocation8 + $0x308] sm:$0xff] }
 0x116   : > { %4051 = vmatpush3.bf16.msra.mxu0 %v4048_v3  ;;  %v1204_v3 = vld [vmem:[#allocation8 + $0x120] sm:$0xff] }
 0x117   : > { %4053 = vmatprep.subr.bf16.mxu0 %v4052_v6 }
 0x11a   : > { %4055 = vmatpush3.bf16.msra.mxu0 %v4052_v6  ;;  %v4144_v6 = vpack.c.bf16 %v1205_v4, %v1204_v3  ;;  %v1311_v3 = vld [vmem:[#allocation8 + $0x1f8] sm:$0xff] }
 0x11b   : > { %4057 = vmatprep.subr.bf16.mxu0 %v4056_v9 }
 0x11e   : > { %4059 = vmatpush3.bf16.msra.mxu0 %v4056_v9  ;;  %v4148_v9 = vpack.c.bf16 %v1207_v8, %v1206_v7  ;;  %v1393_v7 = vld [vmem:[#allocation8 + $0x208] sm:$0xff] }
 0x11f   : > { %4061 = vmatprep.subr.bf16.mxu0 %v4060_v14 }
 0x122   : > { %4063 = vmatpush3.bf16.msra.mxu0 %v4060_v14  ;;  %v4152_v14 = vpack.c.bf16 %v1209_v12, %v1208_v11  ;;  %v1395_v11 = vld [vmem:[#allocation8 + $0x218] sm:$0xff] }
 0x123   : > { %4065 = vmatprep.subr.bf16.mxu0 %v4064_v17 }
 0x126   : > { %4067 = vmatpush3.bf16.msra.mxu0 %v4064_v17  ;;  %v4156_v17 = vpack.c.bf16 %v1211_v16, %v1210_v15  ;;  %v1397_v15 = vld [vmem:[#allocation8 + $0x228] sm:$0xff] }
 0x127   : > { %4069 = vmatprep.subr.bf16.mxu0 %v4068_v20 }
 0x12a   : > { %4071 = vmatpush3.bf16.msra.mxu0 %v4068_v20  ;;  %v4160_v20 = vpack.c.bf16 %v1213_v19, %v1212_v18  ;;  %v1398_v18 = vld [vmem:[#allocation8 + $0x230] sm:$0xff]  ;;  %v1399_v19 = vld [vmem:[#allocation8 + $0x238] sm:$0xff] }
 0x12d   : > { %3472 = vmatmul.mubr.f32.vlgmr.msra.gmra.mrb[0].mxu0 %v900_v21  ;;  %v1214_v21 = vld [vmem:[#allocation8 + $0x170] sm:$0xff] }
 0x12e   : > { %v4164_v23 = vpack.c.bf16 %v1215_v22, %v1214_v21  ;;  %v1400_v21 = vld [vmem:[#allocation8 + $0x240] sm:$0xff]  ;;  %v1401_v22 = vld [vmem:[#allocation8 + $0x248] sm:$0xff] }
 0x200   : > { %v3473_v34 = vpop.f32.mrb[0].mxu0 }
 0x201   : > { %v5012_v35 = vadd.f32 %v3473_v34, %v2930_v33  ;;  %v984_v36 = vpop.f32.mrb[1].mxu0  ;;  %v1704_v34 = vld [vmem:[#allocation11 + $0x10] sm:$0xff] }
 0x202   : > { %v5014_v37 = vadd.f32 %v2930_v33, %v984_v36  ;;  %v1703_v33 = vld [vmem:[#allocation11 + $0x8] sm:$0xff] }
 0x203   : > { %1009 = vst [vmem:[#allocation3 + $0x11] sm:$0xff] %v5012_v35 }
 0x204   : > { %1008 = vst [vmem:[#allocation3 + $0x9] sm:$0xff] %v5014_v37 }
 0x20b   : > { %v1028_v40 = vld [vmem:[#allocation3 + $0x3] sm:$0xff]  ;;  %v1029_v41 = vld [vmem:[#allocation3 + $0xb] sm:$0xff] }
 0x20c   : > { %3506 = vmatprep.mubr.f32.mxu1 %v1028_v40  ;;  %v1011_v2 = vld [vmem:[#allocation3 + $0x8] sm:$0xff]  ;;  %v4300_v40 = vpack.c.bf16 %v1705_v38, %v1704_v34  ;;  %v1491_v38 = vld [vmem:[#allocation8 + $0x298] sm:$0xff] }
 0x20d   : > { %3507 = vmatmul.mubr.f32.vlgmr.msra.gmra.mrb[0].mxu1 %v1029_v41  ;;  %v1197_v5 = vld [vmem:[#allocation3 + $0x6] sm:$0xff]  ;;  %v1198_v29 = vld [vmem:[#allocation3 + $0xe] sm:$0xff] }
 0x20e   : > { %4107 = vmatpush3.bf16.msra.mxu1 %v4104_v32  ;;  %3541 = vmatprep.mubr.f32.mxu1 %v4735_v0  ;;  %v4128_v0 = vpack.c.bf16 %v1025_v55, %v1024_v54  ;;  %v1702_v32 = vld [vmem:[#allocation11] sm:$0xff]  ;;  %v1306_v54 = vld [vmem:[#allocation8 + $0x1d0] sm:$0xff]  ;;  %v1307_v55 = vld [vmem:[#allocation8 + $0x1d8] sm:$0xff] }
 0x20f   : > { %4109 = vmatprep.subr.bf16.mxu1 %v4108_v42  ;;  %v4296_v36 = vpack.c.bf16 %v1703_v33, %v1702_v32  ;;  %v1706_v41 = vld [vmem:[#allocation11 + $0x20] sm:$0xff]  ;;  %v4188_v56 = vpack.c.bf16 %v1307_v55, %v1306_v54  ;;  %v1389_v16 = vld [vmem:[#allocation3 + $0xc] sm:$0xff] }
 0x210   : > { %v1488_v32 = vld [vmem:[#allocation8 + $0x280] sm:$0xff]  ;;  %v1489_v33 = vld [vmem:[#allocation8 + $0x288] sm:$0xff] }
 0x211   : > { %4297 = vmatprep.subr.bf16.mxu0 %v4296_v36  ;;  %v4232_v34 = vpack.c.bf16 %v1489_v33, %v1488_v32  ;;  %v1485_v43 = vld [vmem:[#allocation3 + $0xf] sm:$0xff]  ;;  %v1689_v32 = vld [vmem:[#allocation10 + $0x18] sm:$0xff] }
 0x212   : > { %4111 = vmatpush3.bf16.msra.mxu1 %v4108_v42  ;;  %v1707_v42 = vld [vmem:[#allocation11 + $0x28] sm:$0xff]  ;;  %4299 = vmatpush3.bf16.msra.mxu0 %v4296_v36  ;;  %v1490_v36 = vld [vmem:[#allocation8 + $0x290] sm:$0xff] }
 0x213   : > { %4113 = vmatprep.subr.bf16.mxu1 %v4112_v45  ;;  %4301 = vmatprep.subr.bf16.mxu0 %v4300_v40  ;;  %v1501_v54 = vld [vmem:[#allocation8 + $0x2e8] sm:$0xff] }
 0x216   : > { %4115 = vmatpush3.bf16.msra.mxu1 %v4112_v45  ;;  %v4304_v45 = vpack.c.bf16 %v1707_v42, %v1706_v41  ;;  %4303 = vmatpush3.bf16.msra.mxu0 %v4300_v40  ;;  %v1390_v40 = vld [vmem:[#allocation3 + $0x14] sm:$0xff]  ;;  %v1492_v41 = vld [vmem:[#allocation8 + $0x2a0] sm:$0xff]  ;;  %v1493_v42 = vld [vmem:[#allocation8 + $0x2a8] sm:$0xff] }
 0x217   : > { %4117 = vmatprep.subr.bf16.mxu1 %v4116_v48  ;;  %v4240_v44 = vpack.c.bf16 %v1493_v42, %v1492_v41  ;;  %v1692_v42 = vld [vmem:[#allocation10 + $0x30] sm:$0xff] }
 0x218   : > { %4305 = vmatprep.subr.bf16.mxu0 %v4304_v45 }
 0x21a   : > { %4119 = vmatpush3.bf16.msra.mxu1 %v4116_v48  ;;  %v1709_v48 = vld [vmem:[#allocation11 + $0x38] sm:$0xff]  ;;  %4307 = vmatpush3.bf16.msra.mxu0 %v4304_v45  ;;  %v1494_v45 = vld [vmem:[#allocation8 + $0x2b0] sm:$0xff] }
 0x21b   : > { %4121 = vmatprep.subr.bf16.mxu1 %v4120_v13 }
 0x21e   : > { %4123 = vmatpush3.bf16.msra.mxu1 %v4120_v13  ;;  %v4308_v13 = vpack.c.bf16 %v1709_v48, %v1708_v47  ;;  %v1496_v48 = vld [vmem:[#allocation8 + $0x2c0] sm:$0xff] }
 0x21f   : > { %4125 = vmatprep.subr.bf16.mxu1 %v4124_v53  ;;  %v4248_v50 = vpack.c.bf16 %v1497_v49, %v1496_v48  ;;  %v1696_v48 = vld [vmem:[#allocation10 + $0x50] sm:$0xff]  ;;  %v1697_v49 = vld [vmem:[#allocation10 + $0x58] sm:$0xff] }
 0x220   : > { %4309 = vmatprep.subr.bf16.mxu0 %v4308_v13 }
 0x221   : > { %4311 = vmatpush3.bf16.msra.mxu0 %v4308_v13  ;;  %v1498_v13 = vld [vmem:[#allocation8 + $0x2d0] sm:$0xff] }
 0x222   : > { %4127 = vmatpush3.bf16.msra.mxu1 %v4124_v53  ;;  %v1711_v53 = vld [vmem:[#allocation11 + $0x48] sm:$0xff] }
 0x223   : > { %4129 = vmatprep.subr.bf16.mxu1 %v4128_v0 }
 0x226   : > { %4131 = vmatpush3.bf16.msra.mxu1 %v4128_v0  ;;  %v4312_v0 = vpack.c.bf16 %v1711_v53, %v1710_v52  ;;  %v1500_v53 = vld [vmem:[#allocation8 + $0x2e0] sm:$0xff] }
 0x227   : > { %4133 = vmatprep.subr.bf16.mxu1 %v4132_v58  ;;  %v4256_v55 = vpack.c.bf16 %v1501_v54, %v1500_v53  ;;  %v1701_v53 = vld [vmem:[#allocation10 + $0x78] sm:$0xff] }
 0x228   : > { %4313 = vmatprep.subr.bf16.mxu0 %v4312_v0 }
 0x229   : > { %4315 = vmatpush3.bf16.msra.mxu0 %v4312_v0  ;;  %v1502_v0 = vld [vmem:[#allocation8 + $0x2f0] sm:$0xff] }
 0x22a   : > { %4135 = vmatpush3.bf16.msra.mxu1 %v4132_v58  ;;  %v1713_v58 = vld [vmem:[#allocation11 + $0x58] sm:$0xff] }
 0x22b   : > { %4137 = vmatprep.subr.bf16.mxu1 %v4136_v61 }
 0x22d   : > { %3542 = vmatmul.mubr.f32.vlgmr.msra.gmra.mrb[0].mxu1 %v1011_v2  ;;  %v1310_v2 = vld [vmem:[#allocation8 + $0x1f0] sm:$0xff] }
 0x22e   : > { %4139 = vmatpush3.bf16.msra.mxu1 %v4136_v61  ;;  %3576 = vmatprep.mubr.f32.mxu1 %v1197_v5  ;;  %v4316_v61 = vpack.c.bf16 %v1713_v58, %v1712_v57  ;;  %v4196_v5 = vpack.c.bf16 %v1311_v3, %v1310_v2  ;;  %v1584_v58 = vld [vmem:[#allocation8 + $0x300] sm:$0xff]  ;;  %v1589_v3 = vld [vmem:[#allocation8 + $0x328] sm:$0xff] }
 0x22f   : > { %4141 = vmatprep.subr.bf16.mxu1 %v4140_v1  ;;  %v4264_v60 = vpack.c.bf16 %v1585_v59, %v1584_v58  ;;  %v1588_v2 = vld [vmem:[#allocation8 + $0x320] sm:$0xff] }
 0x230   : > { %4317 = vmatprep.subr.bf16.mxu0 %v4316_v61 }
 0x231   : > { %4319 = vmatpush3.bf16.msra.mxu0 %v4316_v61  ;;  %v1586_v61 = vld [vmem:[#allocation8 + $0x310] sm:$0xff] }
 0x232   : > { %4143 = vmatpush3.bf16.msra.mxu1 %v4140_v1  ;;  %v1715_v1 = vld [vmem:[#allocation11 + $0x68] sm:$0xff] }
 0x233   : > { %4145 = vmatprep.subr.bf16.mxu1 %v4144_v6  ;;  %v4320_v4 = vpack.c.bf16 %v1715_v1, %v1714_v63  ;;  %v1486_v1 = vld [vmem:[#allocation3 + $0x17] sm:$0xff] }
 0x235   : > { %4321 = vmatprep.subr.bf16.mxu0 %v4320_v4 }
 0x236   : > { %4147 = vmatpush3.bf16.msra.mxu1 %v4144_v6  ;;  %v1392_v6 = vld [vmem:[#allocation8 + $0x200] sm:$0xff]  ;;  %4323 = vmatpush3.bf16.msra.mxu0 %v4320_v4  ;;  %v1581_v4 = vld [vmem:[#allocation3 + $0x12] sm:$0xff] }
 0x237   : > { %4149 = vmatprep.subr.bf16.mxu1 %v4148_v9  ;;  %v4200_v8 = vpack.c.bf16 %v1393_v7, %v1392_v6  ;;  %v1590_v6 = vld [vmem:[#allocation8 + $0x330] sm:$0xff]  ;;  %v1591_v7 = vld [vmem:[#allocation8 + $0x338] sm:$0xff] }
 0x23a   : > { %4151 = vmatpush3.bf16.msra.mxu1 %v4148_v9  ;;  %v1394_v9 = vld [vmem:[#allocation8 + $0x210] sm:$0xff] }
 0x23b   : > { %4153 = vmatprep.subr.bf16.mxu1 %v4152_v14  ;;  %v4204_v12 = vpack.c.bf16 %v1395_v11, %v1394_v9  ;;  %v1592_v9 = vld [vmem:[#allocation8 + $0x340] sm:$0xff]  ;;  %v1593_v11 = vld [vmem:[#allocation8 + $0x348] sm:$0xff] }
 0x23e   : > { %4155 = vmatpush3.bf16.msra.mxu1 %v4152_v14  ;;  %v1396_v14 = vld [vmem:[#allocation8 + $0x220] sm:$0xff] }
 0x23f   : > { %4157 = vmatprep.subr.bf16.mxu1 %v4156_v17 }
 0x242   : > { %4159 = vmatpush3.bf16.msra.mxu1 %v4156_v17  ;;  %v4208_v17 = vpack.c.bf16 %v1397_v15, %v1396_v14  ;;  %v1594_v14 = vld [vmem:[#allocation8 + $0x350] sm:$0xff]  ;;  %v1595_v15 = vld [vmem:[#allocation8 + $0x358] sm:$0xff] }
 0x243   : > { %4161 = vmatprep.subr.bf16.mxu1 %v4160_v20 }
 0x246   : > { %4163 = vmatpush3.bf16.msra.mxu1 %v4160_v20  ;;  %v4212_v20 = vpack.c.bf16 %v1399_v19, %v1398_v18  ;;  %v1597_v18 = vld [vmem:[#allocation8 + $0x368] sm:$0xff] }
 0x247   : > { %4165 = vmatprep.subr.bf16.mxu1 %v4164_v23 }
 0x24a   : > { %4167 = vmatpush3.bf16.msra.mxu1 %v4164_v23  ;;  %v4216_v23 = vpack.c.bf16 %v1401_v22, %v1400_v21  ;;  %v1599_v21 = vld [vmem:[#allocation8 + $0x378] sm:$0xff] }
 0x24b   : > { %4169 = vmatprep.subr.bf16.mxu1 %v4168_v26 }
 0x24d   : > { %3577 = vmatmul.mubr.f32.vlgmr.msra.gmra.mrb[0].mxu1 %v1198_v29  ;;  %v1406_v29 = vld [vmem:[#allocation8 + $0x270] sm:$0xff] }
 0x24e   : > { %4171 = vmatpush3.bf16.msra.mxu1 %v4168_v26  ;;  %3611 = vmatprep.mubr.f32.mxu1 %v5014_v37  ;;  %v4220_v26 = vpack.c.bf16 %v1403_v25, %v1402_v24  ;;  %v4228_v31 = vpack.c.bf16 %v1407_v30, %v1406_v29  ;;  %v1716_v24 = vld [vmem:[#allocation11 + $0x70] sm:$0xff]  ;;  %v1717_v25 = vld [vmem:[#allocation11 + $0x78] sm:$0xff] }
 0x24f   : > { %4173 = vmatprep.subr.bf16.mxu1 %v4172_v10  ;;  %v2931_v29 = vld [vmem:[%s5187_s4] ss:$0 sm:$0xff] }
 0x252   : > { %4175 = vmatpush3.bf16.msra.mxu1 %v4172_v10  ;;  %v4224_v10 = vpack.c.bf16 %v1405_v28, %v1404_v27  ;;  %v1686_v27 = vld [vmem:[#allocation10] sm:$0xff]  ;;  %v1687_v28 = vld [vmem:[#allocation10 + $0x8] sm:$0xff] }
 0x253   : > { %4177 = vmatprep.subr.bf16.mxu1 %v4176_v39 }
 0x256   : > { %4179 = vmatpush3.bf16.msra.mxu1 %v4176_v39  ;;  %v4236_v39 = vpack.c.bf16 %v1491_v38, %v1490_v36 }
 0x257   : > { %4181 = vmatprep.subr.bf16.mxu1 %v4180_v46 }
 0x25a   : > { %4183 = vmatpush3.bf16.msra.mxu1 %v4180_v46  ;;  %v1495_v46 = vld [vmem:[#allocation8 + $0x2b8] sm:$0xff] }
 0x25b   : > { %4185 = vmatprep.subr.bf16.mxu1 %v4184_v51  ;;  %v4244_v47 = vpack.c.bf16 %v1495_v46, %v1494_v45  ;;  %v1694_v45 = vld [vmem:[#allocation10 + $0x40] sm:$0xff]  ;;  %v1695_v46 = vld [vmem:[#allocation10 + $0x48] sm:$0xff] }
 0x25e   : > { %4187 = vmatpush3.bf16.msra.mxu1 %v4184_v51  ;;  %v1499_v51 = vld [vmem:[#allocation8 + $0x2d8] sm:$0xff] }
 0x25f   : > { %4189 = vmatprep.subr.bf16.mxu1 %v4188_v56  ;;  %v4252_v52 = vpack.c.bf16 %v1499_v51, %v1498_v13  ;;  %v1698_v13 = vld [vmem:[#allocation10 + $0x60] sm:$0xff]  ;;  %v1699_v51 = vld [vmem:[#allocation10 + $0x68] sm:$0xff] }
 0x262   : > { %4191 = vmatpush3.bf16.msra.mxu1 %v4188_v56  ;;  %v1503_v56 = vld [vmem:[#allocation8 + $0x2f8] sm:$0xff] }
 0x263   : > { %4193 = vmatprep.subr.bf16.mxu1 %v4192_v62  ;;  %v4260_v57 = vpack.c.bf16 %v1503_v56, %v1502_v0 }
 0x266   : > { %4195 = vmatpush3.bf16.msra.mxu1 %v4192_v62  ;;  %v1587_v62 = vld [vmem:[#allocation8 + $0x318] sm:$0xff] }
 0x267   : > { %4197 = vmatprep.subr.bf16.mxu1 %v4196_v5  ;;  %v4268_v63 = vpack.c.bf16 %v1587_v62, %v1586_v61 }
 0x26a   : > { %4199 = vmatpush3.bf16.msra.mxu1 %v4196_v5  ;;  %v4272_v5 = vpack.c.bf16 %v1589_v3, %v1588_v2 }
 0x26b   : > { %4201 = vmatprep.subr.bf16.mxu1 %v4200_v8 }
 0x26d   : > { %3612 = vmatmul.mubr.f32.vlgmr.msra.gmra.mrb[0].mxu1 %v5012_v35 }
 0x26e   : > { %4203 = vmatpush3.bf16.msra.mxu1 %v4200_v8  ;;  %3646 = vmatprep.mubr.f32.mxu1 %v1389_v16  ;;  %v4276_v8 = vpack.c.bf16 %v1591_v7, %v1590_v6  ;;  %v4284_v16 = vpack.c.bf16 %v1595_v15, %v1594_v14  ;;  %v1975_v14 = vld [vmem:[%s5191_s8 + $0x8] sm:$0xff]  ;;  %v2933_v15 = vld [vmem:[%s5191_s8 + $0x20] sm:$0xff] }
 0x26f   : > { %4205 = vmatprep.subr.bf16.mxu1 %v4204_v12 }
 0x272   : > { %4207 = vmatpush3.bf16.msra.mxu1 %v4204_v12  ;;  %v4280_v12 = vpack.c.bf16 %v1593_v11, %v1592_v9 }
 0x273   : > { %4209 = vmatprep.subr.bf16.mxu1 %v4208_v17 }
 0x276   : > { %4211 = vmatpush3.bf16.msra.mxu1 %v4208_v17  ;;  %v1596_v17 = vld [vmem:[#allocation8 + $0x360] sm:$0xff] }
 0x277   : > { %4213 = vmatprep.subr.bf16.mxu1 %v4212_v20  ;;  %v4288_v19 = vpack.c.bf16 %v1597_v18, %v1596_v17  ;;  %v2934_v17 = vld [vmem:[%s5191_s8 + $0x28] sm:$0xff]  ;;  %v1976_v18 = vld [vmem:[%s5191_s8 + $0x10] sm:$0xff] }
 0x27a   : > { %4215 = vmatpush3.bf16.msra.mxu1 %v4212_v20  ;;  %v1598_v20 = vld [vmem:[#allocation8 + $0x370] sm:$0xff] }
 0x27b   : > { %4217 = vmatprep.subr.bf16.mxu1 %v4216_v23  ;;  %v4292_v22 = vpack.c.bf16 %v1599_v21, %v1598_v20 }
 0x27e   : > { %4219 = vmatpush3.bf16.msra.mxu1 %v4216_v23  ;;  %v1582_v23 = vld [vmem:[#allocation3 + $0x1a] sm:$0xff] }
 0x27f   : > { %4221 = vmatprep.subr.bf16.mxu1 %v4220_v26 }
 0x282   : > { %4223 = vmatpush3.bf16.msra.mxu1 %v4220_v26  ;;  %v4324_v26 = vpack.c.bf16 %v1717_v25, %v1716_v24  ;;  %v2935_v24 = vld [vmem:[%s5191_s8 + $0x30] sm:$0xff]  ;;  %v2936_v25 = vld [vmem:[%s5191_s8 + $0x38] sm:$0xff] }
 0x283   : > { %4225 = vmatprep.subr.bf16.mxu1 %v4224_v10 }
 0x284   : > { %4325 = vmatprep.subr.bf16.mxu0 %v4324_v26 }
 0x285   : > { %4327 = vmatpush3.bf16.msra.mxu0 %v4324_v26  ;;  %v4567_v26 = vld [vmem:[#allocation3] sm:$0xff] }
 0x286   : > { %4227 = vmatpush3.bf16.msra.mxu1 %v4224_v10  ;;  %v4328_v10 = vpack.c.bf16 %v1687_v28, %v1686_v27  ;;  %1956 = vst.msk [vmem:[#allocation5] sm:$0x7] %vm1955_vm0, %v4567_v26  ;;  %1957 = vst.msk [vmem:[#allocation5 + $0x13] sm:$0x7] %vm1955_vm0, %v4567_v26 }
 0x287   : > { %4229 = vmatprep.subr.bf16.mxu1 %v4228_v31 }
 0x288   : > { %4329 = vmatprep.subr.bf16.mxu0 %v4328_v10 }
 0x28a   : > { %4231 = vmatpush3.bf16.msra.mxu1 %v4228_v31  ;;  %v1688_v31 = vld [vmem:[#allocation10 + $0x10] sm:$0xff] }
 0x28b   : > { %4233 = vmatprep.subr.bf16.mxu1 %v4232_v34  ;;  %v4332_v38 = vpack.c.bf16 %v1689_v32, %v1688_v31 }
 0x28d   : > { %3647 = vmatmul.mubr.f32.vlgmr.msra.gmra.mrb[0].mxu1 %v1390_v40  ;;  %v1691_v40 = vld [vmem:[#allocation10 + $0x28] sm:$0xff] }
 0x28e   : > { %4235 = vmatpush3.bf16.msra.mxu1 %v4232_v34  ;;  %3681 = vmatprep.mubr.f32.mxu1 %v1485_v43  ;;  %v1693_v43 = vld [vmem:[#allocation10 + $0x38] sm:$0xff] }
 0x28f   : > { %4237 = vmatprep.subr.bf16.mxu1 %v4236_v39 }
 0x292   : > { %4239 = vmatpush3.bf16.msra.mxu1 %v4236_v39  ;;  %v1690_v39 = vld [vmem:[#allocation10 + $0x20] sm:$0xff] }
 0x293   : > { %4241 = vmatprep.subr.bf16.mxu1 %v4240_v44  ;;  %v4336_v41 = vpack.c.bf16 %v1691_v40, %v1690_v39 }
 0x296   : > { %4243 = vmatpush3.bf16.msra.mxu1 %v4240_v44  ;;  %v4340_v44 = vpack.c.bf16 %v1693_v43, %v1692_v42  ;;  %v2941_v43 = vld [vmem:[%s5191_s8 + $0x40] sm:$0xff] }
 0x297   : > { %4245 = vmatprep.subr.bf16.mxu1 %v4244_v47 }
 0x29a   : > { %4247 = vmatpush3.bf16.msra.mxu1 %v4244_v47  ;;  %v4344_v47 = vpack.c.bf16 %v1695_v46, %v1694_v45 }
 0x29b   : > { %4249 = vmatprep.subr.bf16.mxu1 %v4248_v50 }
 0x29e   : > { %4251 = vmatpush3.bf16.msra.mxu1 %v4248_v50  ;;  %v4348_v50 = vpack.c.bf16 %v1697_v49, %v1696_v48 }
 0x29f   : > { %4253 = vmatprep.subr.bf16.mxu1 %v4252_v52 }
 0x2a2   : > { %4255 = vmatpush3.bf16.msra.mxu1 %v4252_v52  ;;  %v1700_v52 = vld [vmem:[#allocation10 + $0x70] sm:$0xff] }
 0x2a3   : > { %4257 = vmatprep.subr.bf16.mxu1 %v4256_v55  ;;  %v4356_v54 = vpack.c.bf16 %v1701_v53, %v1700_v52 }
 0x2a6   : > { %4259 = vmatpush3.bf16.msra.mxu1 %v4256_v55  ;;  %v2932_v55 = vld [vmem:[%s5190_s7] ss:$0 sm:$0xff] }
 0x2a7   : > { %4261 = vmatprep.subr.bf16.mxu1 %v4260_v57 }
 0x2aa   : > { %4263 = vmatpush3.bf16.msra.mxu1 %v4260_v57 }
 0x2ab   : > { %4265 = vmatprep.subr.bf16.mxu1 %v4264_v60 }
 0x2ad   : > { %3682 = vmatmul.mubr.f32.vlgmr.msra.gmra.mrb[0].mxu1 %v1486_v1 }
 0x2ae   : > { %4267 = vmatpush3.bf16.msra.mxu1 %v4264_v60  ;;  %3716 = vmatprep.mubr.f32.mxu1 %v1581_v4 }
 0x2af   : > { %4269 = vmatprep.subr.bf16.mxu1 %v4268_v63 }
 0x2b2   : > { %4271 = vmatpush3.bf16.msra.mxu1 %v4268_v63 }
 0x2b3   : > { %4273 = vmatprep.subr.bf16.mxu1 %v4272_v5 }
 0x2b6   : > { %4275 = vmatpush3.bf16.msra.mxu1 %v4272_v5 }
 0x2b7   : > { %4277 = vmatprep.subr.bf16.mxu1 %v4276_v8 }
 0x2ba   : > { %4279 = vmatpush3.bf16.msra.mxu1 %v4276_v8 }
 0x2bb   : > { %4281 = vmatprep.subr.bf16.mxu1 %v4280_v12 }
 0x2be   : > { %4283 = vmatpush3.bf16.msra.mxu1 %v4280_v12  ;;  %v1974_v12 = vld [vmem:[%s5191_s8] sm:$0xff] }
 0x2bf   : > { %4285 = vmatprep.subr.bf16.mxu1 %v4284_v16 }
 0x2c2   : > { %4287 = vmatpush3.bf16.msra.mxu1 %v4284_v16  ;;  %v4368_v16 = vpack.c.bf16 %v1975_v14, %v1974_v12  ;;  %v2954_v12 = vld [vmem:[%s5191_s8 + $0x88] sm:$0xff] }
 0x2c3   : > { %4289 = vmatprep.subr.bf16.mxu1 %v4288_v19 }
 0x2c6   : > { %4291 = vmatpush3.bf16.msra.mxu1 %v4288_v19  ;;  %v1977_v19 = vld [vmem:[%s5191_s8 + $0x18] sm:$0xff] }
 0x2c7   : > { %4293 = vmatprep.subr.bf16.mxu1 %v4292_v22 }
 0x2ca   : > { %4295 = vmatpush3.bf16.msra.mxu1 %v4292_v22  ;;  %v4360_v22 = vpack.c.bf16 %v2934_v17, %v2933_v15  ;;  %v2956_v17 = vld [vmem:[%s5191_s8 + $0x98] sm:$0xff] }
 0x2cc   : > { %4361 = vmatprep.subr.bf16.mxu1 %v4360_v22 }
 0x2cd   : > { %3717 = vmatmul.mubr.f32.vlgmr.msra.gmra.mrb[0].mxu1 %v1582_v23  ;;  %v4372_v23 = vpack.c.bf16 %v1977_v19, %v1976_v18 }
 0x2ce   : > { %4363 = vmatpush3.bf16.msra.mxu1 %v4360_v22 }
 0x3a0   : > { %v3718_v30 = vpop.f32.mrb[0].mxu1 }
 0x3a1   : > { %v1666_v33 = vpop.f32.mrb[1].mxu1  ;;  %v1685_v36 = vadd.f32 %v3718_v30, %v2931_v29 }
 0x3a2   : > { %v1684_v34 = vadd.f32 %v2931_v29, %v1666_v33  ;;  %v4364_v29 = vpack.c.bf16 %v2936_v25, %v2935_v24  ;;  %v2961_v24 = vld [vmem:[%s5191_s8 + $0xb0] sm:$0xff]  ;;  %v2962_v25 = vld [vmem:[%s5191_s8 + $0xb8] sm:$0xff] }
 0x3a3   : > { %v4404_v26 = vpack.c.bf16 %v2962_v25, %v2961_v24 }
 0x3a4   : > { %3751 = vmatprep.mubr.f32.mxu0 %v1684_v34  ;;  %4365 = vmatprep.subr.bf16.mxu1 %v4364_v29 }
 0x3a5   : > { %3752 = vmatmul.mubr.f32.vlgmr.msra.gmra.mrb[2].mxu0 %v1685_v36  ;;  %4367 = vmatpush3.bf16.msra.mxu1 %v4364_v29 }
 0x3a6   : > { %4331 = vmatpush3.bf16.msra.mxu0 %v4328_v10  ;;  %3786 = vmatprep.mubr.f32.mxu0 %v5014_v37  ;;  %v4352_v37 = vpack.c.bf16 %v1699_v51, %v1698_v13 }
 0x3a7   : > { %4333 = vmatprep.subr.bf16.mxu0 %v4332_v38 }
 0x3aa   : > { %4335 = vmatpush3.bf16.msra.mxu0 %v4332_v38 }
 0x3ab   : > { %4337 = vmatprep.subr.bf16.mxu0 %v4336_v41 }
 0x3ae   : > { %4339 = vmatpush3.bf16.msra.mxu0 %v4336_v41 }
 0x3af   : > { %4341 = vmatprep.subr.bf16.mxu0 %v4340_v44 }
 0x3b2   : > { %4343 = vmatpush3.bf16.msra.mxu0 %v4340_v44  ;;  %v2942_v44 = vld [vmem:[%s5191_s8 + $0x48] sm:$0xff] }
 0x3b3   : > { %4345 = vmatprep.subr.bf16.mxu0 %v4344_v47  ;;  %v4376_v45 = vpack.c.bf16 %v2942_v44, %v2941_v43  ;;  %v2622_v43 = vld [vmem:[%s5193_s10 + $0x18] sm:$0xff] }
 0x3b6   : > { %4347 = vmatpush3.bf16.msra.mxu0 %v4344_v47 }
 0x3b7   : > { %4349 = vmatprep.subr.bf16.mxu0 %v4348_v50 }
 0x3ba   : > { %4351 = vmatpush3.bf16.msra.mxu0 %v4348_v50 }
 0x3bb   : > { %4353 = vmatprep.subr.bf16.mxu0 %v4352_v37 }
 0x3be   : > { %4355 = vmatpush3.bf16.msra.mxu0 %v4352_v37 }
 0x3bf   : > { %4357 = vmatprep.subr.bf16.mxu0 %v4356_v54 }
 0x3c2   : > { %4359 = vmatpush3.bf16.msra.mxu0 %v4356_v54 }
 0x3c3   : > { %4369 = vmatprep.subr.bf16.mxu0 %v4368_v16 }
 0x3c5   : > { %3787 = vmatmul.mubr.f32.vlgmr.msra.gmra.mrb[2].mxu0 %v5012_v35 }
 0x3c6   : > { %4371 = vmatpush3.bf16.msra.mxu0 %v4368_v16  ;;  %v2955_v16 = vld [vmem:[%s5191_s8 + $0x90] sm:$0xff] }
 0x3c7   : > { %4373 = vmatprep.subr.bf16.mxu0 %v4372_v23  ;;  %v4396_v18 = vpack.c.bf16 %v2956_v17, %v2955_v16  ;;  %v2718_v17 = vld [vmem:[#allocation13 + $0x60] sm:$0xff] }
 0x3ca   : > { %4375 = vmatpush3.bf16.msra.mxu0 %v4372_v23 }
 0x3cb   : > { %4377 = vmatprep.subr.bf16.mxu0 %v4376_v45 }
 0x498   : > { %v3788_v0 = vpop.f32.mrb[2].mxu0 }
 0x499   : > { %v5029_v56 = vadd.f32 %v3788_v0, %v2932_v55  ;;  %v1859_v57 = vpop.f32.mrb[3].mxu0 }
 0x49a   : > { %v5033_v58 = vadd.f32 %v2932_v55, %v1859_v57 }
 0x49b   : > { %1895 = vrot.lane.b32.xlu1 %v5029_v56, %s4736_s22  ;;  %1885 = vrot.lane.b32.xlu0 %v5029_v56, %s4737_s23 }
 0x49f   : > { %1905 = vrot.lane.b32.xlu1 %v5029_v56, %s4738_s24  ;;  %1883 = vrot.lane.b32.xlu0 %v5033_v58, %s4737_s23 }
 0x4a3   : > { %1915 = vrot.lane.b32.xlu1 %v5029_v56, %s4739_s30  ;;  %1903 = vrot.lane.b32.xlu0 %v5033_v58, %s4738_s24 }
 0x4a7   : > { %1893 = vrot.lane.b32.xlu1 %v5033_v58, %s4736_s22  ;;  %1913 = vrot.lane.b32.xlu0 %v5033_v58, %s4739_s30 }
 0x4ab   : > { %1925 = vrot.lane.b32.xlu1 %v5029_v56, %s4740_s16  ;;  %1923 = vrot.lane.b32.xlu0 %v5033_v58, %s4740_s16 }
 0x4af   : > { %1935 = vrot.lane.b32.xlu1 %v5029_v56, %s4741_s19  ;;  %1933 = vrot.lane.b32.xlu0 %v5033_v58, %s4741_s19 }
 0x4b3   : > { %1945 = vrot.lane.b32.xlu1 %v5029_v56, %s4742_s18  ;;  %1943 = vrot.lane.b32.xlu0 %v5033_v58, %s4742_s18 }
 0x50d   : > { %v1896_v35 = vpop.permute.xlu1 %1895  ;;  %v1886_v59 = vpop.permute.xlu0 %1885 }
 0x50e   : > { %v1890_v62 = vadd.f32 %v1886_v59, %v5029_v56  ;;  %v1892_v2 = vmax.f32 %v5029_v56, %v1886_v59  ;;  %v2944_v59 = vld [vmem:[%s5191_s8 + $0x58] sm:$0xff] }
 0x510   : > { %v1900_v5 = vadd.f32 %v1896_v35, %v1890_v62  ;;  %v1902_v8 = vmax.f32 %v1892_v2, %v1896_v35  ;;  %v2943_v35 = vld [vmem:[%s5191_s8 + $0x50] sm:$0xff]  ;;  %v2947_v2 = vld [vmem:[%s5191_s8 + $0x60] sm:$0xff] }
 0x511   : > { %v1906_v60 = vpop.permute.xlu1 %1905  ;;  %v1884_v61 = vpop.permute.xlu0 %1883 }
 0x512   : > { %v1889_v3 = vadd.f32 %v1884_v61, %v5033_v58  ;;  %v1891_v4 = vmax.f32 %v5033_v58, %v1884_v61  ;;  %v1910_v27 = vadd.f32 %v1906_v60, %v1900_v5  ;;  %v1912_v30 = vmax.f32 %v1902_v8, %v1906_v60 }
 0x515   : > { %v1916_v63 = vpop.permute.xlu1 %1915  ;;  %v1904_v1 = vpop.permute.xlu0 %1903 }
 0x516   : > { %v1920_v33 = vadd.f32 %v1916_v63, %v1910_v27  ;;  %v1922_v34 = vmax.f32 %v1912_v30, %v1916_v63  ;;  %v4380_v63 = vpack.c.bf16 %v2944_v59, %v2943_v35 }
 0x519   : > { %v1894_v6 = vpop.permute.xlu1 %1893  ;;  %v1914_v7 = vpop.permute.xlu0 %1913 }
 0x51a   : > { %v1899_v9 = vadd.f32 %v1894_v6, %v1889_v3  ;;  %v1901_v11 = vmax.f32 %v1891_v4, %v1894_v6  ;;  %v2948_v3 = vld [vmem:[%s5191_s8 + $0x68] sm:$0xff]  ;;  %v2949_v6 = vld [vmem:[%s5191_s8 + $0x70] sm:$0xff] }
 0x51b   : > { %v4384_v5 = vpack.c.bf16 %v2948_v3, %v2947_v2  ;;  %v2710_v3 = vld [vmem:[#allocation13 + $0x20] sm:$0xff] }
 0x51c   : > { %v1909_v20 = vadd.f32 %v1904_v1, %v1899_v9  ;;  %v1911_v21 = vmax.f32 %v1901_v11, %v1904_v1  ;;  %v2953_v11 = vld [vmem:[%s5191_s8 + $0x80] sm:$0xff] }
 0x51d   : > { %v1926_v28 = vpop.permute.xlu1 %1925  ;;  %v1924_v10 = vpop.permute.xlu0 %1923  ;;  %v4392_v15 = vpack.c.bf16 %v2954_v12, %v2953_v11  ;;  %v2715_v11 = vld [vmem:[#allocation13 + $0x48] sm:$0xff] }
 0x51e   : > { %v1919_v31 = vadd.f32 %v1914_v7, %v1909_v20  ;;  %v1921_v32 = vmax.f32 %v1911_v21, %v1914_v7  ;;  %v1930_v41 = vadd.f32 %v1926_v28, %v1920_v33  ;;  %v1932_v42 = vmax.f32 %v1922_v34, %v1926_v28  ;;  %v2950_v7 = vld [vmem:[%s5191_s8 + $0x78] sm:$0xff]  ;;  %v2959_v20 = vld [vmem:[%s5191_s8 + $0xa0] sm:$0xff]  ;;  %v2960_v21 = vld [vmem:[%s5191_s8 + $0xa8] sm:$0xff] }
 0x51f   : > { %v4388_v8 = vpack.c.bf16 %v2950_v7, %v2949_v6  ;;  %v4400_v23 = vpack.c.bf16 %v2960_v21, %v2959_v20  ;;  %v2965_v28 = vld [vmem:[%s5191_s8 + $0xc0] sm:$0xff]  ;;  %v2713_v7 = vld [vmem:[#allocation13 + $0x38] sm:$0xff] }
 0x520   : > { %v1929_v36 = vadd.f32 %v1924_v10, %v1919_v31  ;;  %v1931_v38 = vmax.f32 %v1921_v32, %v1924_v10  ;;  %v2966_v10 = vld [vmem:[%s5191_s8 + $0xc8] sm:$0xff]  ;;  %v2967_v31 = vld [vmem:[%s5191_s8 + $0xd0] sm:$0xff]  ;;  %v2968_v32 = vld [vmem:[%s5191_s8 + $0xd8] sm:$0xff] }
 0x521   : > { %v1936_v39 = vpop.permute.xlu1 %1935  ;;  %v1934_v40 = vpop.permute.xlu0 %1933  ;;  %v4408_v30 = vpack.c.bf16 %v2966_v10, %v2965_v28  ;;  %v4412_v33 = vpack.c.bf16 %v2968_v32, %v2967_v31  ;;  %v2712_v6 = vld [vmem:[#allocation13 + $0x30] sm:$0xff]  ;;  %v2721_v21 = vld [vmem:[#allocation13 + $0x78] sm:$0xff] }
 0x522   : > { %v1940_v46 = vadd.f32 %v1936_v39, %v1930_v41  ;;  %v1942_v47 = vmax.f32 %v1932_v42, %v1936_v39  ;;  %v1939_v48 = vadd.f32 %v1934_v40, %v1929_v36  ;;  %v1941_v49 = vmax.f32 %v1931_v38, %v1934_v40  ;;  %v2619_v39 = vld [vmem:[%s5193_s10] sm:$0xff]  ;;  %v2620_v40 = vld [vmem:[%s5193_s10 + $0x8] sm:$0xff]  ;;  %v2621_v41 = vld [vmem:[%s5193_s10 + $0x10] sm:$0xff] }
 0x523   : > { %v4416_v42 = vpack.c.bf16 %v2620_v40, %v2619_v39  ;;  %v4420_v44 = vpack.c.bf16 %v2622_v43, %v2621_v41  ;;  %v2720_v20 = vld [vmem:[#allocation13 + $0x70] sm:$0xff] }
 0x525   : > { %v1946_v50 = vpop.permute.xlu1 %1945  ;;  %v1944_v13 = vpop.permute.xlu0 %1943  ;;  %4417 = vmatprep.subr.bf16.mxu1 %v4416_v42 }
 0x526   : > { %v1950_v51 = vadd.f32 %v1946_v50, %v1940_v46  ;;  %v1952_v37 = vmax.f32 %v1942_v47, %v1946_v50  ;;  %v1949_v52 = vadd.f32 %v1944_v13, %v1939_v48  ;;  %v1951_v53 = vmax.f32 %v1941_v49, %v1944_v13  ;;  %v2707_v46 = vld [vmem:[#allocation13 + $0x8] sm:$0xff]  ;;  %v2971_v13 = vld [vmem:[%s5192_s9] ss:$0 sm:$0xff] }
 0x528   : > { %v1954_v54 = vmul.f32 0.125, %v1950_v51  ;;  %v1953_v55 = vmul.f32 0.125, %v1949_v52  ;;  %1965 = vrot.lane.b32.xlu1 %v1952_v37, %s4742_s18  ;;  %1963 = vrot.lane.b32.xlu0 %v1951_v53, %s4742_s18 }
 0x52a   : > { %1960 = vst.msk [vmem:[#allocation5 + $0xb] sm:$0xff] %vm1958_vm1, %v1954_v54  ;;  %1959 = vst.msk [vmem:[#allocation5 + $0x3] sm:$0xff] %vm1958_vm1, %v1953_v55 }
 0x59a   : > { %v1966_v0 = vpop.permute.xlu1 %1965  ;;  %v1964_v57 = vpop.permute.xlu0 %1963 }
 0x59b   : > { %1971 = vst.msk [vmem:[#allocation5 + $0xb] sm:$0xff] %vm1969_vm2, %v1966_v0  ;;  %1970 = vst.msk [vmem:[#allocation5 + $0x3] sm:$0xff] %vm1969_vm2, %v1964_v57 }
 0x5a2   : > { %v1978_v60 = vld [vmem:[#allocation5 + $0x1] sm:$0xff]  ;;  %v1979_v62 = vld [vmem:[#allocation5 + $0x9] sm:$0xff] }
 0x5a3   : > { %v1972_v61 = vld [vmem:[#allocation5] sm:$0xff]  ;;  %3797 = vmatprep.mubr.msk.f32.mxu1 %vm1985_vm3, %v1978_v60  ;;  %v1973_v1 = vld [vmem:[#allocation5 + $0x8] sm:$0xff] }
 0x5a4   : > { %3808 = vmatprep.mubr.msk.f32.mxu0 %vm1985_vm3, %v1972_v61  ;;  %3798 = vmatmul.mubr.msk.f32.vlgmr.msra.gmra.mrb[2].mxu1 %vm1985_vm3, %v1979_v62  ;;  %v2148_v4 = vld [vmem:[#allocation5 + $0x2] sm:$0xff]  ;;  %v2149_v9 = vld [vmem:[#allocation5 + $0xa] sm:$0xff] }
 0x5a5   : > { %3809 = vmatmul.mubr.msk.f32.vlgmr.msra.gmra.mrb[4].mxu0 %vm1985_vm3, %v1973_v1  ;;  %v2238_v14 = vld [vmem:[#allocation5 + $0x3] sm:$0xff]  ;;  %v2239_v19 = vld [vmem:[#allocation5 + $0xb] sm:$0xff]  ;;  %4419 = vmatpush3.bf16.msra.mxu1 %v4416_v42 }
 0x5a6   : > { %4379 = vmatpush3.bf16.msra.mxu0 %v4376_v45  ;;  %3819 = vmatprep.mubr.msk.f32.mxu0 %vm1985_vm3, %v2148_v4  ;;  %v2328_v22 = vld [vmem:[#allocation5 + $0x4] sm:$0xff]  ;;  %v2329_v27 = vld [vmem:[#allocation5 + $0xc] sm:$0xff]  ;;  %v2706_v45 = vld [vmem:[#allocation13] sm:$0xff] }
 0x5a7   : > { %4381 = vmatprep.subr.bf16.mxu0 %v4380_v63  ;;  %v2418_v29 = vld [vmem:[#allocation5 + $0x5] sm:$0xff]  ;;  %v2419_v34 = vld [vmem:[#allocation5 + $0xd] sm:$0xff]  ;;  %4421 = vmatprep.subr.bf16.mxu1 %v4420_v44  ;;  %v4424_v47 = vpack.c.bf16 %v2707_v46, %v2706_v45 }
 0x5a8   : > { %v2508_v36 = vld [vmem:[#allocation5 + $0x6] sm:$0xff]  ;;  %v2509_v38 = vld [vmem:[#allocation5 + $0xe] sm:$0xff] }
 0x5a9   : > { %4423 = vmatpush3.bf16.msra.mxu1 %v4420_v44  ;;  %v2708_v61 = vld [vmem:[#allocation13 + $0x10] sm:$0xff]  ;;  %v2709_v62 = vld [vmem:[#allocation13 + $0x18] sm:$0xff]  ;;  %v2711_v4 = vld [vmem:[#allocation13 + $0x28] sm:$0xff] }
 0x5aa   : > { %4383 = vmatpush3.bf16.msra.mxu0 %v4380_v63  ;;  %4425 = vmatprep.subr.bf16.mxu1 %v4424_v47  ;;  %v4428_v1 = vpack.c.bf16 %v2709_v62, %v2708_v61 }
 0x5ab   : > { %4385 = vmatprep.subr.bf16.mxu0 %v4384_v5 }
 0x5ad   : > { %3820 = vmatmul.mubr.msk.f32.vlgmr.msra.gmra.mrb[4].mxu0 %vm1985_vm3, %v2149_v9  ;;  %v2714_v9 = vld [vmem:[#allocation13 + $0x40] sm:$0xff] }
 0x5ae   : > { %4387 = vmatpush3.bf16.msra.mxu0 %v4384_v5  ;;  %3830 = vmatprep.mubr.msk.f32.mxu0 %vm1985_vm3, %v2238_v14  ;;  %v4432_v5 = vpack.c.bf16 %v2711_v4, %v2710_v3  ;;  %v4440_v12 = vpack.c.bf16 %v2715_v11, %v2714_v9  ;;  %v2716_v14 = vld [vmem:[#allocation13 + $0x50] sm:$0xff] }
 0x5af   : > { %4389 = vmatprep.subr.bf16.mxu0 %v4388_v8 }
 0x5b2   : > { %4391 = vmatpush3.bf16.msra.mxu0 %v4388_v8  ;;  %v4436_v8 = vpack.c.bf16 %v2713_v7, %v2712_v6 }
 0x5b3   : > { %4393 = vmatprep.subr.bf16.mxu0 %v4392_v15 }
 0x5b5   : > { %3831 = vmatmul.mubr.msk.f32.vlgmr.msra.gmra.mrb[4].mxu0 %vm1985_vm3, %v2239_v19 }
 0x5b6   : > { %4395 = vmatpush3.bf16.msra.mxu0 %v4392_v15  ;;  %3841 = vmatprep.mubr.msk.f32.mxu0 %vm1985_vm3, %v2328_v22  ;;  %v2717_v15 = vld [vmem:[#allocation13 + $0x58] sm:$0xff]  ;;  %v4452_v22 = vpack.c.bf16 %v2721_v21, %v2720_v20 }
 0x5b7   : > { %4397 = vmatprep.subr.bf16.mxu0 %v4396_v18  ;;  %v4444_v16 = vpack.c.bf16 %v2717_v15, %v2716_v14 }
 0x5ba   : > { %4399 = vmatpush3.bf16.msra.mxu0 %v4396_v18  ;;  %v2719_v18 = vld [vmem:[#allocation13 + $0x68] sm:$0xff] }
 0x5bb   : > { %4401 = vmatprep.subr.bf16.mxu0 %v4400_v23  ;;  %v4448_v19 = vpack.c.bf16 %v2719_v18, %v2718_v17 }
 0x5bd   : > { %3842 = vmatmul.mubr.msk.f32.vlgmr.msra.gmra.mrb[4].mxu0 %vm1985_vm3, %v2329_v27  ;;  %v2976_v27 = vld [vmem:[%s5213_s15] ss:$0 sm:$0xff] }
 0x5be   : > { %4403 = vmatpush3.bf16.msra.mxu0 %v4400_v23  ;;  %3852 = vmatprep.mubr.msk.f32.mxu0 %vm1985_vm3, %v2418_v29 }
 0x5bf   : > { %4405 = vmatprep.subr.bf16.mxu0 %v4404_v26 }
 0x5c2   : > { %4407 = vmatpush3.bf16.msra.mxu0 %v4404_v26 }
 0x5c3   : > { %4409 = vmatprep.subr.bf16.mxu0 %v4408_v30 }
 0x5c5   : > { %3853 = vmatmul.mubr.msk.f32.vlgmr.msra.gmra.mrb[4].mxu0 %vm1985_vm3, %v2419_v34 }
 0x5c6   : > { %4411 = vmatpush3.bf16.msra.mxu0 %v4408_v30  ;;  %3863 = vmatprep.mubr.msk.f32.mxu0 %vm1985_vm3, %v2508_v36 }
 0x5c7   : > { %4413 = vmatprep.subr.bf16.mxu0 %v4412_v33 }
 0x5ca   : > { %4415 = vmatpush3.bf16.msra.mxu0 %v4412_v33 }
 0x5cd   : > { %3864 = vmatmul.mubr.msk.f32.vlgmr.msra.gmra.mrb[4].mxu0 %vm1985_vm3, %v2509_v38 }
 0x677   : > { %v3799_v48 = vpop.f32.mrb[2].mxu1 }
 0x678   : > { %v2058_v49 = vpop.f32.mrb[3].mxu1 }
 0x6a0   : > { %v3865_v50 = vpop.f32.mrb[4].mxu0 }
 0x6a1   : > { %v4456_v51 = vadd.f32 %v3865_v50, %v3799_v48  ;;  %v2587_v37 = vpop.f32.mrb[5].mxu0 }
 0x6a2   : > { %v4457_v52 = vadd.f32 %v2587_v37, %v2058_v49 }
 0x6a3   : > { %v2606_v53 = vadd.f32 %v4456_v51, %v2971_v13 }
 0x6a4   : > { %v2605_v54 = vadd.f32 %v4457_v52, %v2971_v13 }
 0x6a5   : > { %v2973_v55 = vmul.f32 -1.442695, %v2606_v53 }
 0x6a6   : > { %v2972_v0 = vmul.f32 -1.442695, %v2605_v54 }
 0x6a7   : > { %4559 = vpow2.f32 %v2973_v55 }
 0x6a8   : > { %4561 = vpow2.f32 %v2972_v0 }
 0x6b1   : > { %v4560_v57 = vpop.eup %4559 }
 0x6b2   : > { %v4562_v35 = vpop.eup %4561  ;;  %v2614_v59 = vadd.f32 1.0, %v4560_v57 }
 0x6b3   : > { %v2613_v60 = vadd.f32 1.0, %v4562_v35 }
 0x6b5   : > { %4563 = vrcp.f32 %v2613_v60 }
 0x6b6   : > { %4565 = vrcp.f32 %v2614_v59 }
 0x6bf   : > { %v4564_v63 = vpop.eup %4563 }
 0x6c0   : > { %v4566_v2 = vpop.eup %4565  ;;  %3874 = vmatprep.mubr.msk.f32.mxu1 %vm1985_vm3, %v4564_v63 }
 0x6c1   : > { %3875 = vmatmul.mubr.msk.f32.vlgmr.msra.gmra.mrb[4].mxu1 %vm1985_vm3, %v4566_v2 }
 0x6c2   : > { %4427 = vmatpush3.bf16.msra.mxu1 %v4424_v47 }
 0x6c3   : > { %4429 = vmatprep.subr.bf16.mxu1 %v4428_v1 }
 0x6c6   : > { %4431 = vmatpush3.bf16.msra.mxu1 %v4428_v1 }
 0x6c7   : > { %4433 = vmatprep.subr.bf16.mxu1 %v4432_v5 }
 0x6ca   : > { %4435 = vmatpush3.bf16.msra.mxu1 %v4432_v5 }
 0x6cb   : > { %4437 = vmatprep.subr.bf16.mxu1 %v4436_v8 }
 0x6ce   : > { %4439 = vmatpush3.bf16.msra.mxu1 %v4436_v8 }
 0x6cf   : > { %4441 = vmatprep.subr.bf16.mxu1 %v4440_v12 }
 0x6d2   : > { %4443 = vmatpush3.bf16.msra.mxu1 %v4440_v12 }
 0x6d3   : > { %4445 = vmatprep.subr.bf16.mxu1 %v4444_v16 }
 0x6d6   : > { %4447 = vmatpush3.bf16.msra.mxu1 %v4444_v16 }
 0x6d7   : > { %4449 = vmatprep.subr.bf16.mxu1 %v4448_v19 }
 0x6da   : > { %4451 = vmatpush3.bf16.msra.mxu1 %v4448_v19 }
 0x6db   : > { %4453 = vmatprep.subr.bf16.mxu1 %v4452_v22 }
 0x6de   : > { %4455 = vmatpush3.bf16.msra.mxu1 %v4452_v22 }
 0x794   : > { %v3876_v23 = vpop.f32.mrb[4].mxu1 }
 0x795   : > { %v2695_v24 = vpop.f32.mrb[5].mxu1  ;;  %v2705_v26 = vmul.f32 %v3876_v23, %v5029_v56 }
 0x796   : > { %v2704_v25 = vmul.f32 %v2695_v24, %v5033_v58 }
 0x798   : > { %3909 = vmatprep.mubr.f32.mxu1 %v2704_v25 }
 0x799   : > { %3910 = vmatmul.mubr.f32.vlgmr.msra.gmra.mrb[6].mxu1 %v2705_v26 }
 0x86c   : > { %v3911_v28 = vpop.f32.mrb[6].mxu1 }
 0x86d   : > { %v2801_v10 = vadd.f32 %v3911_v28, %v2976_v27  ;;  %v2795_v29 = vpop.f32.mrb[7].mxu1 }
 0x86e   : > { %v2796_v30 = vadd.f32 %v2976_v27, %v2795_v29 }
 0x86f   : > { %2805 = vst [vmem:[%s513_s14 + $0x8] sm:$0xff] %v2801_v10 }
 0x870   : > { %2804 = vst [vmem:[%s513_s14] sm:$0xff] %v2796_v30 }
 0x871 PF: > { %s5215_s29 = sld [smem:[#allocation17_spill]] }
 0x877   : > { %s26_s25 = sadd.s32 1, %s5215_s29  }
 0x878   : > { %p23_p6 = scmp.ge.s32.totalorder %s26_s25, 6  }
 0x87a   :  { %25 = sbr.rel (!%p23_p6) target bundleno = 6 (0x6), region = 139 }
 0x881   :  { %2827 = vsyncpa [#allocation7], 1 }
 0x882   :  { %2829 = vsyncpa [#allocation7 + $0x1], 1 }
 0x883   :  { %2830 = vsyncpa [#allocation9], 1 }
 0x884   :  { %2831 = vsyncpa [#allocation12], 1 }

</bundles_post_ra>
